<compile_context>
chip_gen: v7x
topology: tpu7x:2x2x1
jax: 0.10.0
libtpu: 0.0.40
codegen_flags: <defaults>
</compile_context>

<pallas_src>
import functools

import jax
import jax.numpy as jnp
from jax.experimental import pallas as pl
from jax.experimental.pallas import tpu as pltpu

EMB_DIM = 32
NUM_LAYER = 5
NUM_CLASS = 4
BN_EPS = 1e-5

_VMEM = pl.BlockSpec(memory_space=pltpu.MemorySpace.VMEM)
_SMEM = pl.BlockSpec(memory_space=pltpu.MemorySpace.SMEM)


# ----------------------------- Fused Pallas kernel -----------------------------

def _gnn_fused_kernel(eps_ref, a_ref, s_ref, st_ref, p_ref, h0_ref,
                      gw1_ref, gt1_ref, gw2_ref, gt2_ref,
                      vw1_ref, vt1_ref, vw2_ref, vt2_ref,
                      pw_ref, pb_ref, o_ref, *, num_layer):
    """Entire GNN forward. All BN affines / linear biases are pre-folded into (W', T')."""
    A = a_ref[...]        # [N, N]  dense adjacency (A[target, source] = multiplicity)
    S = s_ref[...]        # [G, N]  sum-pool / membership one-hot
    St = st_ref[...]      # [N, G]  = S^T (precomputed to avoid in-kernel transpose)
    h = h0_ref[...]       # [N, D]  atom embeddings
    G = S.shape[0]
    D = h.shape[1]

    # virtual node embedding initialised to zeros (constant_(0) in __init__)
    v = jnp.zeros((G, D), jnp.float32)

    for layer in range(num_layer):          # fixed trip count -> fully unrolled at trace time
        eps = eps_ref[layer]                # scalar from SMEM (GINConv.eps, train_eps init 0)

        # h_list[layer] += virtualnode_emb[batch]   ==   h + S^T @ v
        h_aug = h + jnp.dot(St, v, preferred_element_type=jnp.float32)

        # GIN aggregation: sum_{j in N(i)} h_j  ==  A @ H
        agg = jnp.dot(A, h_aug, preferred_element_type=jnp.float32)
        x = (1.0 + eps) * h_aug + agg

        # GIN MLP: Linear(D,2D)+BN(2D) (folded) -> ReLU -> Linear(2D,D)+outer BN(D) (folded)
        y = jnp.dot(x, gw1_ref[layer], preferred_element_type=jnp.float32) + gt1_ref[layer]
        y = jnp.maximum(y, 0.0)
        z = jnp.dot(y, gw2_ref[layer], preferred_element_type=jnp.float32) + gt2_ref[layer]
        if layer != num_layer - 1:          # F.relu for all but the last layer; dropout = identity
            z = jnp.maximum(z, 0.0)

        if layer < num_layer - 1:
            # virtual node update: global_add_pool(h_list[layer]) + v -> Lin/BN/ReLU/Lin/BN/ReLU
            pooled = jnp.dot(S, h_aug, preferred_element_type=jnp.float32) + v
            vy = jnp.dot(pooled, vw1_ref[layer], preferred_element_type=jnp.float32) + vt1_ref[layer]
            vy = jnp.maximum(vy, 0.0)
            vz = jnp.dot(vy, vw2_ref[layer], preferred_element_type=jnp.float32) + vt2_ref[layer]
            v = jnp.maximum(vz, 0.0)        # dropout = identity (eval mode)

        h = z

    # JK == 'last' -> node_representation = h_list[-1]; mean pool + prediction linear
    g = jnp.dot(p_ref[...], h, preferred_element_type=jnp.float32)            # [G, D]
    o_ref[...] = jnp.dot(g, pw_ref[...], preferred_element_type=jnp.float32) + pb_ref[...]


# ----------------------------- Parameter init (raw, matches the PyTorch module) ----------------

def init_raw_params(key, emb_dim=EMB_DIM, num_layer=NUM_LAYER, num_class=NUM_CLASS):
    keys = iter(jax.random.split(key, 256))

    def lin(din, dout):
        w = 0.1 * jax.random.normal(next(keys), (din, dout), jnp.float32)
        b = 0.1 * jax.random.normal(next(keys), (dout,), jnp.float32)
        return w, b

    def bn(d):
        return dict(
            gamma=1.0 + 0.05 * jax.random.normal(next(keys), (d,), jnp.float32),
            beta=0.05 * jax.random.normal(next(keys), (d,), jnp.float32),
            mean=0.05 * jax.random.normal(next(keys), (d,), jnp.float32),
            var=1.0 + 0.1 * jax.random.uniform(next(keys), (d,), jnp.float32),
        )

    p = {"atom_emb": 0.1 * jax.random.normal(next(keys), (1, emb_dim), jnp.float32)}

    layers = []
    for _ in range(num_layer):
        w1, b1 = lin(emb_dim, 2 * emb_dim)
        bn1 = bn(2 * emb_dim)
        w2, b2 = lin(2 * emb_dim, emb_dim)
        bn2 = bn(emb_dim)                       # outer batch_norms[layer]
        layers.append(dict(w1=w1, b1=b1, bn1=bn1, w2=w2, b2=b2, bn2=bn2,
                           eps=jnp.zeros((), jnp.float32)))  # GINConv train_eps=True, init 0
    p["layers"] = layers

    vn_layers = []
    for _ in range(num_layer - 1):              # only the first num_layer-1 VN MLPs are used
        w1, b1 = lin(emb_dim, 2 * emb_dim)
        bn1 = bn(2 * emb_dim)
        w2, b2 = lin(2 * emb_dim, emb_dim)
        bn2 = bn(emb_dim)
        vn_layers.append(dict(w1=w1, b1=b1, bn1=bn1, w2=w2, b2=b2, bn2=bn2))
    p["vn_layers"] = vn_layers

    pw, pb = lin(emb_dim, num_class)
    p["pred_w"], p["pred_b"] = pw, pb
    return p


# ----------------------------- BN/bias folding (exact eval-mode refactor) -----------------------

def _fold_linear_bn(w, b, bn):
    """y = BN(x @ w + b)  ==  x @ (w*scale) + (b*scale + shift), with full running-stat fold."""
    scale = bn["gamma"] / jnp.sqrt(bn["var"] + BN_EPS)
    shift = bn["beta"] - bn["mean"] * scale
    return w * scale[None, :], (b * scale + shift)[None, :]


def fold_params(raw):
    gw1, gt1, gw2, gt2, eps = [], [], [], [], []
    for lp in raw["layers"]:
        w1f, t1f = _fold_linear_bn(lp["w1"], lp["b1"], lp["bn1"])
        w2f, t2f = _fold_linear_bn(lp["w2"], lp["b2"], lp["bn2"])  # outer BN folded into Linear2
        gw1.append(w1f); gt1.append(t1f); gw2.append(w2f); gt2.append(t2f)
        eps.append(lp["eps"])
    vw1, vt1, vw2, vt2 = [], [], [], []
    for vp in raw["vn_layers"]:
        w1f, t1f = _fold_linear_bn(vp["w1"], vp["b1"], vp["bn1"])
        w2f, t2f = _fold_linear_bn(vp["w2"], vp["b2"], vp["bn2"])
        vw1.append(w1f); vt1.append(t1f); vw2.append(w2f); vt2.append(t2f)
    return dict(
        atom_emb=raw["atom_emb"],
        eps=jnp.stack(eps).astype(jnp.float32),                 # [L]       (SMEM)
        gw1=jnp.stack(gw1), gt1=jnp.stack(gt1),                 # [L,D,2D], [L,1,2D]
        gw2=jnp.stack(gw2), gt2=jnp.stack(gt2),                 # [L,2D,D], [L,1,D]
        vw1=jnp.stack(vw1), vt1=jnp.stack(vt1),                 # [L-1,...]
        vw2=jnp.stack(vw2), vt2=jnp.stack(vt2),
        pred_w=raw["pred_w"], pred_b=raw["pred_b"][None, :],
    )


# ----------------------------- Forward (single pallas_call) -------------------------------------

def gnn_forward(folded, x, edge_index, batch, num_graphs):
    N = x.shape[0]
    x_idx = x.reshape(N) if (x.ndim > 1 and x.shape[1] == 1) else x
    h0 = folded["atom_emb"][x_idx]                                  # [N, D] atom embedding lookup

    # dense adjacency: A[target, source] = edge multiplicity (GIN sum aggregation)
    A = jnp.zeros((N, N), jnp.float32).at[edge_index[1], edge_index[0]].add(1.0)

    # membership one-hot S[g,n]; mean-pool P = S / counts; St = S^T for the in-kernel v[batch]
    one_hot = (batch[None, :] == jnp.arange(num_graphs)[:, None]).astype(jnp.float32)  # [G, N]
    counts = jnp.maximum(one_hot.sum(axis=1, keepdims=True), 1.0)
    S, St, P = one_hot, one_hot.T, one_hot / counts

    C = folded["pred_w"].shape[1]
    kernel = functools.partial(_gnn_fused_kernel, num_layer=NUM_LAYER)

    # TODO(synk): for large sparse graphs replace the dense A[N,N]@H with a CSR/segment-sum
    # formulation (PrefetchScalarGridSpec row offsets + gather DMA) and row-tile A over a
    # "parallel" grid axis; at N=16/D=32 everything fits comfortably in VMEM as whole arrays.
    return pl.pallas_call(
        kernel,
        out_shape=jax.ShapeDtypeStruct((num_graphs, C), jnp.float32),
        in_specs=[_SMEM] + [_VMEM] * 15,
        out_specs=_VMEM,
    )(folded["eps"], A, S, St, P, h0,
      folded["gw1"], folded["gt1"], folded["gw2"], folded["gt2"],
      folded["vw1"], folded["vt1"], folded["vw2"], folded["vt2"],
      folded["pred_w"], folded["pred_b"])


# ----------------------------- Pure-JAX reference (unfolded, eval-mode BN) ----------------------

def gnn_reference(raw, x, edge_index, batch, num_graphs):
    N = x.shape[0]
    x_idx = x.reshape(N) if (x.ndim > 1 and x.shape[1] == 1) else x
    h = raw["atom_emb"][x_idx]
    A = jnp.zeros((N, N), jnp.float32).at[edge_index[1], edge_index[0]].add(1.0)
    one_hot = (batch[None, :] == jnp.arange(num_graphs)[:, None]).astype(jnp.float32)
    counts = jnp.maximum(one_hot.sum(axis=1, keepdims=True), 1.0)

    def bn_eval(t, bn):
        return (t - bn["mean"]) / jnp.sqrt(bn["var"] + BN_EPS) * bn["gamma"] + bn["beta"]

    v = jnp.zeros((num_graphs, EMB_DIM), jnp.float32)
    for layer in range(NUM_LAYER):
        lp = raw["layers"][layer]
        h_aug = h + v[batch]
        xx = (1.0 + lp["eps"]) * h_aug + A @ h_aug
        y = jnp.maximum(bn_eval(xx @ lp["w1"] + lp["b1"], lp["bn1"]), 0.0)
        z = bn_eval(y @ lp["w2"] + lp["b2"], lp["bn2"])
        if layer != NUM_LAYER - 1:
            z = jnp.maximum(z, 0.0)
        if layer < NUM_LAYER - 1:
            vp = raw["vn_layers"][layer]
            pooled = one_hot @ h_aug + v
            vy = jnp.maximum(bn_eval(pooled @ vp["w1"] + vp["b1"], vp["bn1"]), 0.0)
            v = jnp.maximum(bn_eval(vy @ vp["w2"] + vp["b2"], vp["bn2"]), 0.0)
        h = z
    g = (one_hot / counts) @ h
    return g @ raw["pred_w"] + raw["pred_b"]


# ----------------------------- Main -----------------------------

if __name__ == "__main__":
    key = jax.random.PRNGKey(0)

    N = 16            # total nodes in the batch
    G = 2             # number of graphs
    nodes_per_graph = N // G

    # node feature indices (Embedding has a single row -> all zeros), shape [N, 1]
    x = jnp.zeros((N, 1), jnp.int32)

    # batch assignment: nodes 0..7 -> graph 0, nodes 8..15 -> graph 1
    batch = jnp.repeat(jnp.arange(G, dtype=jnp.int32), nodes_per_graph)

    # deterministic bidirectional ring edges within each graph
    src_list, dst_list = [], []
    for g in range(G):
        base = g * nodes_per_graph
        for i in range(nodes_per_graph):
            a = base + i
            b = base + (i + 1) % nodes_per_graph
            src_list += [a, b]
            dst_list += [b, a]
    edge_index = jnp.array([src_list, dst_list], dtype=jnp.int32)  # [2, E]

    raw = init_raw_params(key)
    folded = fold_params(raw)

    out = gnn_forward(folded, x, edge_index, batch, num_graphs=G)
    out = jax.block_until_ready(out)
    assert out.shape == (G, NUM_CLASS)
    assert bool(jnp.all(jnp.isfinite(out)))

    ref = gnn_reference(raw, x, edge_index, batch, num_graphs=G)
    max_err = float(jnp.max(jnp.abs(out - ref)))
    assert max_err < 1e-3, f"mismatch vs pure-JAX reference: {max_err}"

    print("KERNEL_OK")
</pallas_src>

<mosaic_0001>
module attributes {stable_mosaic.version = 11 : i64} {
  func.func @_gnn_fused_kernel(%arg0: memref<5xf32, #tpu.memory_space<smem>>, %arg1: memref<16x16xf32, #tpu.memory_space<vmem>>, %arg2: memref<2x16xf32, #tpu.memory_space<vmem>>, %arg3: memref<16x2xf32, #tpu.memory_space<vmem>>, %arg4: memref<2x16xf32, #tpu.memory_space<vmem>>, %arg5: memref<16x32xf32, #tpu.memory_space<vmem>>, %arg6: memref<5x32x64xf32, #tpu.memory_space<vmem>>, %arg7: memref<5x1x64xf32, #tpu.memory_space<vmem>>, %arg8: memref<5x64x32xf32, #tpu.memory_space<vmem>>, %arg9: memref<5x1x32xf32, #tpu.memory_space<vmem>>, %arg10: memref<4x32x64xf32, #tpu.memory_space<vmem>>, %arg11: memref<4x1x64xf32, #tpu.memory_space<vmem>>, %arg12: memref<4x64x32xf32, #tpu.memory_space<vmem>>, %arg13: memref<4x1x32xf32, #tpu.memory_space<vmem>>, %arg14: memref<32x4xf32, #tpu.memory_space<vmem>>, %arg15: memref<1x4xf32, #tpu.memory_space<vmem>>, %arg16: memref<2x4xf32, #tpu.memory_space<vmem>>) attributes {dimension_semantics = [], scalar_prefetch = 0 : i64, scratch_operands = 0 : i64, tpu.core_type = #tpu.core_type<tc>} {
    %c0 = arith.constant 0 : index
    %c0_0 = arith.constant 0 : index
    %0 = vector.load %arg1[%c0, %c0_0] : memref<16x16xf32, #tpu.memory_space<vmem>>, vector<16x16xf32>
    %c0_1 = arith.constant 0 : index
    %c0_2 = arith.constant 0 : index
    %1 = vector.load %arg2[%c0_1, %c0_2] : memref<2x16xf32, #tpu.memory_space<vmem>>, vector<2x16xf32>
    %c0_3 = arith.constant 0 : index
    %c0_4 = arith.constant 0 : index
    %2 = vector.load %arg3[%c0_3, %c0_4] : memref<16x2xf32, #tpu.memory_space<vmem>>, vector<16x2xf32>
    %c0_5 = arith.constant 0 : index
    %c0_6 = arith.constant 0 : index
    %3 = vector.load %arg5[%c0_5, %c0_6] : memref<16x32xf32, #tpu.memory_space<vmem>>, vector<16x32xf32>
    %cst = arith.constant 0.000000e+00 : f32
    %4 = vector.broadcast %cst : f32 to vector<2x32xf32>
    %c0_7 = arith.constant 0 : index
    %5 = memref.load %arg0[%c0_7] : memref<5xf32, #tpu.memory_space<smem>>
    %cst_8 = arith.constant dense<0.000000e+00> : vector<16x32xf32>
    %6 = tpu.matmul %2, %4, %cst_8 {dimension_numbers = #tpu.dot_dimension_numbers<[1], [0], [0], [1], [0, 0, 1, 1], [], []>} : vector<16x2xf32>, vector<2x32xf32>, vector<16x32xf32> -> vector<16x32xf32>
    %7 = arith.addf %3, %6 : vector<16x32xf32>
    %cst_9 = arith.constant dense<0.000000e+00> : vector<16x32xf32>
    %8 = tpu.matmul %0, %7, %cst_9 {dimension_numbers = #tpu.dot_dimension_numbers<[1], [0], [0], [1], [0, 0, 1, 1], [], []>} : vector<16x16xf32>, vector<16x32xf32>, vector<16x32xf32> -> vector<16x32xf32>
    %cst_10 = arith.constant 1.000000e+00 : f32
    %9 = arith.addf %cst_10, %5 : f32
    %10 = vector.broadcast %9 : f32 to vector<16x32xf32>
    %11 = arith.mulf %10, %7 : vector<16x32xf32>
    %12 = arith.addf %11, %8 : vector<16x32xf32>
    %c0_11 = arith.constant 0 : index
    %c0_12 = arith.constant 0 : index
    %c0_13 = arith.constant 0 : index
    %13 = vector.load %arg6[%c0_11, %c0_12, %c0_13] : memref<5x32x64xf32, #tpu.memory_space<vmem>>, vector<1x32x64xf32>
    %14 = vector.shape_cast %13 : vector<1x32x64xf32> to vector<32x64xf32>
    %cst_14 = arith.constant dense<0.000000e+00> : vector<16x64xf32>
    %15 = tpu.matmul %12, %14, %cst_14 {dimension_numbers = #tpu.dot_dimension_numbers<[1], [0], [0], [1], [0, 0, 1, 1], [], []>} : vector<16x32xf32>, vector<32x64xf32>, vector<16x64xf32> -> vector<16x64xf32>
    %c0_15 = arith.constant 0 : index
    %c0_16 = arith.constant 0 : index
    %c0_17 = arith.constant 0 : index
    %16 = vector.load %arg7[%c0_15, %c0_16, %c0_17] : memref<5x1x64xf32, #tpu.memory_space<vmem>>, vector<1x1x64xf32>
    %17 = vector.shape_cast %16 : vector<1x1x64xf32> to vector<1x64xf32>
    %18 = vector.broadcast %17 : vector<1x64xf32> to vector<16x64xf32>
    %19 = arith.addf %15, %18 : vector<16x64xf32>
    %cst_18 = arith.constant 0.000000e+00 : f32
    %20 = vector.broadcast %cst_18 : f32 to vector<16x64xf32>
    %21 = arith.maximumf %19, %20 : vector<16x64xf32>
    %c0_19 = arith.constant 0 : index
    %c0_20 = arith.constant 0 : index
    %c0_21 = arith.constant 0 : index
    %22 = vector.load %arg8[%c0_19, %c0_20, %c0_21] : memref<5x64x32xf32, #tpu.memory_space<vmem>>, vector<1x64x32xf32>
    %23 = vector.shape_cast %22 : vector<1x64x32xf32> to vector<64x32xf32>
    %cst_22 = arith.constant dense<0.000000e+00> : vector<16x32xf32>
    %24 = tpu.matmul %21, %23, %cst_22 {dimension_numbers = #tpu.dot_dimension_numbers<[1], [0], [0], [1], [0, 0, 1, 1], [], []>} : vector<16x64xf32>, vector<64x32xf32>, vector<16x32xf32> -> vector<16x32xf32>
    %c0_23 = arith.constant 0 : index
    %c0_24 = arith.constant 0 : index
    %c0_25 = arith.constant 0 : index
    %25 = vector.load %arg9[%c0_23, %c0_24, %c0_25] : memref<5x1x32xf32, #tpu.memory_space<vmem>>, vector<1x1x32xf32>
    %26 = vector.shape_cast %25 : vector<1x1x32xf32> to vector<1x32xf32>
    %27 = vector.broadcast %26 : vector<1x32xf32> to vector<16x32xf32>
    %28 = arith.addf %24, %27 : vector<16x32xf32>
    %cst_26 = arith.constant 0.000000e+00 : f32
    %29 = vector.broadcast %cst_26 : f32 to vector<16x32xf32>
    %30 = arith.maximumf %28, %29 : vector<16x32xf32>
    %cst_27 = arith.constant dense<0.000000e+00> : vector<2x32xf32>
    %31 = tpu.matmul %1, %7, %cst_27 {dimension_numbers = #tpu.dot_dimension_numbers<[1], [0], [0], [1], [0, 0, 1, 1], [], []>} : vector<2x16xf32>, vector<16x32xf32>, vector<2x32xf32> -> vector<2x32xf32>
    %32 = arith.addf %31, %4 : vector<2x32xf32>
    %c0_28 = arith.constant 0 : index
    %c0_29 = arith.constant 0 : index
    %c0_30 = arith.constant 0 : index
    %33 = vector.load %arg10[%c0_28, %c0_29, %c0_30] : memref<4x32x64xf32, #tpu.memory_space<vmem>>, vector<1x32x64xf32>
    %34 = vector.shape_cast %33 : vector<1x32x64xf32> to vector<32x64xf32>
    %cst_31 = arith.constant dense<0.000000e+00> : vector<2x64xf32>
    %35 = tpu.matmul %32, %34, %cst_31 {dimension_numbers = #tpu.dot_dimension_numbers<[1], [0], [0], [1], [0, 0, 1, 1], [], []>} : vector<2x32xf32>, vector<32x64xf32>, vector<2x64xf32> -> vector<2x64xf32>
    %c0_32 = arith.constant 0 : index
    %c0_33 = arith.constant 0 : index
    %c0_34 = arith.constant 0 : index
    %36 = vector.load %arg11[%c0_32, %c0_33, %c0_34] : memref<4x1x64xf32, #tpu.memory_space<vmem>>, vector<1x1x64xf32>
    %37 = vector.shape_cast %36 : vector<1x1x64xf32> to vector<1x64xf32>
    %38 = vector.broadcast %37 : vector<1x64xf32> to vector<2x64xf32>
    %39 = arith.addf %35, %38 : vector<2x64xf32>
    %cst_35 = arith.constant 0.000000e+00 : f32
    %40 = vector.broadcast %cst_35 : f32 to vector<2x64xf32>
    %41 = arith.maximumf %39, %40 : vector<2x64xf32>
    %c0_36 = arith.constant 0 : index
    %c0_37 = arith.constant 0 : index
    %c0_38 = arith.constant 0 : index
    %42 = vector.load %arg12[%c0_36, %c0_37, %c0_38] : memref<4x64x32xf32, #tpu.memory_space<vmem>>, vector<1x64x32xf32>
    %43 = vector.shape_cast %42 : vector<1x64x32xf32> to vector<64x32xf32>
    %cst_39 = arith.constant dense<0.000000e+00> : vector<2x32xf32>
    %44 = tpu.matmul %41, %43, %cst_39 {dimension_numbers = #tpu.dot_dimension_numbers<[1], [0], [0], [1], [0, 0, 1, 1], [], []>} : vector<2x64xf32>, vector<64x32xf32>, vector<2x32xf32> -> vector<2x32xf32>
    %c0_40 = arith.constant 0 : index
    %c0_41 = arith.constant 0 : index
    %c0_42 = arith.constant 0 : index
    %45 = vector.load %arg13[%c0_40, %c0_41, %c0_42] : memref<4x1x32xf32, #tpu.memory_space<vmem>>, vector<1x1x32xf32>
    %46 = vector.shape_cast %45 : vector<1x1x32xf32> to vector<1x32xf32>
    %47 = vector.broadcast %46 : vector<1x32xf32> to vector<2x32xf32>
    %48 = arith.addf %44, %47 : vector<2x32xf32>
    %cst_43 = arith.constant 0.000000e+00 : f32
    %49 = vector.broadcast %cst_43 : f32 to vector<2x32xf32>
    %50 = arith.maximumf %48, %49 : vector<2x32xf32>
    %c1 = arith.constant 1 : index
    %51 = memref.load %arg0[%c1] : memref<5xf32, #tpu.memory_space<smem>>
    %cst_44 = arith.constant dense<0.000000e+00> : vector<16x32xf32>
    %52 = tpu.matmul %2, %50, %cst_44 {dimension_numbers = #tpu.dot_dimension_numbers<[1], [0], [0], [1], [0, 0, 1, 1], [], []>} : vector<16x2xf32>, vector<2x32xf32>, vector<16x32xf32> -> vector<16x32xf32>
    %53 = arith.addf %30, %52 : vector<16x32xf32>
    %cst_45 = arith.constant dense<0.000000e+00> : vector<16x32xf32>
    %54 = tpu.matmul %0, %53, %cst_45 {dimension_numbers = #tpu.dot_dimension_numbers<[1], [0], [0], [1], [0, 0, 1, 1], [], []>} : vector<16x16xf32>, vector<16x32xf32>, vector<16x32xf32> -> vector<16x32xf32>
    %cst_46 = arith.constant 1.000000e+00 : f32
    %55 = arith.addf %cst_46, %51 : f32
    %56 = vector.broadcast %55 : f32 to vector<16x32xf32>
    %57 = arith.mulf %56, %53 : vector<16x32xf32>
    %58 = arith.addf %57, %54 : vector<16x32xf32>
    %c1_47 = arith.constant 1 : index
    %c0_48 = arith.constant 0 : index
    %c0_49 = arith.constant 0 : index
    %59 = vector.load %arg6[%c1_47, %c0_48, %c0_49] : memref<5x32x64xf32, #tpu.memory_space<vmem>>, vector<1x32x64xf32>
    %60 = vector.shape_cast %59 : vector<1x32x64xf32> to vector<32x64xf32>
    %cst_50 = arith.constant dense<0.000000e+00> : vector<16x64xf32>
    %61 = tpu.matmul %58, %60, %cst_50 {dimension_numbers = #tpu.dot_dimension_numbers<[1], [0], [0], [1], [0, 0, 1, 1], [], []>} : vector<16x32xf32>, vector<32x64xf32>, vector<16x64xf32> -> vector<16x64xf32>
    %c1_51 = arith.constant 1 : index
    %c0_52 = arith.constant 0 : index
    %c0_53 = arith.constant 0 : index
    %62 = vector.load %arg7[%c1_51, %c0_52, %c0_53] : memref<5x1x64xf32, #tpu.memory_space<vmem>>, vector<1x1x64xf32>
    %63 = vector.shape_cast %62 : vector<1x1x64xf32> to vector<1x64xf32>
    %64 = vector.broadcast %63 : vector<1x64xf32> to vector<16x64xf32>
    %65 = arith.addf %61, %64 : vector<16x64xf32>
    %cst_54 = arith.constant 0.000000e+00 : f32
    %66 = vector.broadcast %cst_54 : f32 to vector<16x64xf32>
    %67 = arith.maximumf %65, %66 : vector<16x64xf32>
    %c1_55 = arith.constant 1 : index
    %c0_56 = arith.constant 0 : index
    %c0_57 = arith.constant 0 : index
    %68 = vector.load %arg8[%c1_55, %c0_56, %c0_57] : memref<5x64x32xf32, #tpu.memory_space<vmem>>, vector<1x64x32xf32>
    %69 = vector.shape_cast %68 : vector<1x64x32xf32> to vector<64x32xf32>
    %cst_58 = arith.constant dense<0.000000e+00> : vector<16x32xf32>
    %70 = tpu.matmul %67, %69, %cst_58 {dimension_numbers = #tpu.dot_dimension_numbers<[1], [0], [0], [1], [0, 0, 1, 1], [], []>} : vector<16x64xf32>, vector<64x32xf32>, vector<16x32xf32> -> vector<16x32xf32>
    %c1_59 = arith.constant 1 : index
    %c0_60 = arith.constant 0 : index
    %c0_61 = arith.constant 0 : index
    %71 = vector.load %arg9[%c1_59, %c0_60, %c0_61] : memref<5x1x32xf32, #tpu.memory_space<vmem>>, vector<1x1x32xf32>
    %72 = vector.shape_cast %71 : vector<1x1x32xf32> to vector<1x32xf32>
    %73 = vector.broadcast %72 : vector<1x32xf32> to vector<16x32xf32>
    %74 = arith.addf %70, %73 : vector<16x32xf32>
    %cst_62 = arith.constant 0.000000e+00 : f32
    %75 = vector.broadcast %cst_62 : f32 to vector<16x32xf32>
    %76 = arith.maximumf %74, %75 : vector<16x32xf32>
    %cst_63 = arith.constant dense<0.000000e+00> : vector<2x32xf32>
    %77 = tpu.matmul %1, %53, %cst_63 {dimension_numbers = #tpu.dot_dimension_numbers<[1], [0], [0], [1], [0, 0, 1, 1], [], []>} : vector<2x16xf32>, vector<16x32xf32>, vector<2x32xf32> -> vector<2x32xf32>
    %78 = arith.addf %77, %50 : vector<2x32xf32>
    %c1_64 = arith.constant 1 : index
    %c0_65 = arith.constant 0 : index
    %c0_66 = arith.constant 0 : index
    %79 = vector.load %arg10[%c1_64, %c0_65, %c0_66] : memref<4x32x64xf32, #tpu.memory_space<vmem>>, vector<1x32x64xf32>
    %80 = vector.shape_cast %79 : vector<1x32x64xf32> to vector<32x64xf32>
    %cst_67 = arith.constant dense<0.000000e+00> : vector<2x64xf32>
    %81 = tpu.matmul %78, %80, %cst_67 {dimension_numbers = #tpu.dot_dimension_numbers<[1], [0], [0], [1], [0, 0, 1, 1], [], []>} : vector<2x32xf32>, vector<32x64xf32>, vector<2x64xf32> -> vector<2x64xf32>
    %c1_68 = arith.constant 1 : index
    %c0_69 = arith.constant 0 : index
    %c0_70 = arith.constant 0 : index
    %82 = vector.load %arg11[%c1_68, %c0_69, %c0_70] : memref<4x1x64xf32, #tpu.memory_space<vmem>>, vector<1x1x64xf32>
    %83 = vector.shape_cast %82 : vector<1x1x64xf32> to vector<1x64xf32>
    %84 = vector.broadcast %83 : vector<1x64xf32> to vector<2x64xf32>
    %85 = arith.addf %81, %84 : vector<2x64xf32>
    %cst_71 = arith.constant 0.000000e+00 : f32
    %86 = vector.broadcast %cst_71 : f32 to vector<2x64xf32>
    %87 = arith.maximumf %85, %86 : vector<2x64xf32>
    %c1_72 = arith.constant 1 : index
    %c0_73 = arith.constant 0 : index
    %c0_74 = arith.constant 0 : index
    %88 = vector.load %arg12[%c1_72, %c0_73, %c0_74] : memref<4x64x32xf32, #tpu.memory_space<vmem>>, vector<1x64x32xf32>
    %89 = vector.shape_cast %88 : vector<1x64x32xf32> to vector<64x32xf32>
    %cst_75 = arith.constant dense<0.000000e+00> : vector<2x32xf32>
    %90 = tpu.matmul %87, %89, %cst_75 {dimension_numbers = #tpu.dot_dimension_numbers<[1], [0], [0], [1], [0, 0, 1, 1], [], []>} : vector<2x64xf32>, vector<64x32xf32>, vector<2x32xf32> -> vector<2x32xf32>
    %c1_76 = arith.constant 1 : index
    %c0_77 = arith.constant 0 : index
    %c0_78 = arith.constant 0 : index
    %91 = vector.load %arg13[%c1_76, %c0_77, %c0_78] : memref<4x1x32xf32, #tpu.memory_space<vmem>>, vector<1x1x32xf32>
    %92 = vector.shape_cast %91 : vector<1x1x32xf32> to vector<1x32xf32>
    %93 = vector.broadcast %92 : vector<1x32xf32> to vector<2x32xf32>
    %94 = arith.addf %90, %93 : vector<2x32xf32>
    %cst_79 = arith.constant 0.000000e+00 : f32
    %95 = vector.broadcast %cst_79 : f32 to vector<2x32xf32>
    %96 = arith.maximumf %94, %95 : vector<2x32xf32>
    %c2 = arith.constant 2 : index
    %97 = memref.load %arg0[%c2] : memref<5xf32, #tpu.memory_space<smem>>
    %cst_80 = arith.constant dense<0.000000e+00> : vector<16x32xf32>
    %98 = tpu.matmul %2, %96, %cst_80 {dimension_numbers = #tpu.dot_dimension_numbers<[1], [0], [0], [1], [0, 0, 1, 1], [], []>} : vector<16x2xf32>, vector<2x32xf32>, vector<16x32xf32> -> vector<16x32xf32>
    %99 = arith.addf %76, %98 : vector<16x32xf32>
    %cst_81 = arith.constant dense<0.000000e+00> : vector<16x32xf32>
    %100 = tpu.matmul %0, %99, %cst_81 {dimension_numbers = #tpu.dot_dimension_numbers<[1], [0], [0], [1], [0, 0, 1, 1], [], []>} : vector<16x16xf32>, vector<16x32xf32>, vector<16x32xf32> -> vector<16x32xf32>
    %cst_82 = arith.constant 1.000000e+00 : f32
    %101 = arith.addf %cst_82, %97 : f32
    %102 = vector.broadcast %101 : f32 to vector<16x32xf32>
    %103 = arith.mulf %102, %99 : vector<16x32xf32>
    %104 = arith.addf %103, %100 : vector<16x32xf32>
    %c2_83 = arith.constant 2 : index
    %c0_84 = arith.constant 0 : index
    %c0_85 = arith.constant 0 : index
    %105 = vector.load %arg6[%c2_83, %c0_84, %c0_85] : memref<5x32x64xf32, #tpu.memory_space<vmem>>, vector<1x32x64xf32>
    %106 = vector.shape_cast %105 : vector<1x32x64xf32> to vector<32x64xf32>
    %cst_86 = arith.constant dense<0.000000e+00> : vector<16x64xf32>
    %107 = tpu.matmul %104, %106, %cst_86 {dimension_numbers = #tpu.dot_dimension_numbers<[1], [0], [0], [1], [0, 0, 1, 1], [], []>} : vector<16x32xf32>, vector<32x64xf32>, vector<16x64xf32> -> vector<16x64xf32>
    %c2_87 = arith.constant 2 : index
    %c0_88 = arith.constant 0 : index
    %c0_89 = arith.constant 0 : index
    %108 = vector.load %arg7[%c2_87, %c0_88, %c0_89] : memref<5x1x64xf32, #tpu.memory_space<vmem>>, vector<1x1x64xf32>
    %109 = vector.shape_cast %108 : vector<1x1x64xf32> to vector<1x64xf32>
    %110 = vector.broadcast %109 : vector<1x64xf32> to vector<16x64xf32>
    %111 = arith.addf %107, %110 : vector<16x64xf32>
    %cst_90 = arith.constant 0.000000e+00 : f32
    %112 = vector.broadcast %cst_90 : f32 to vector<16x64xf32>
    %113 = arith.maximumf %111, %112 : vector<16x64xf32>
    %c2_91 = arith.constant 2 : index
    %c0_92 = arith.constant 0 : index
    %c0_93 = arith.constant 0 : index
    %114 = vector.load %arg8[%c2_91, %c0_92, %c0_93] : memref<5x64x32xf32, #tpu.memory_space<vmem>>, vector<1x64x32xf32>
    %115 = vector.shape_cast %114 : vector<1x64x32xf32> to vector<64x32xf32>
    %cst_94 = arith.constant dense<0.000000e+00> : vector<16x32xf32>
    %116 = tpu.matmul %113, %115, %cst_94 {dimension_numbers = #tpu.dot_dimension_numbers<[1], [0], [0], [1], [0, 0, 1, 1], [], []>} : vector<16x64xf32>, vector<64x32xf32>, vector<16x32xf32> -> vector<16x32xf32>
    %c2_95 = arith.constant 2 : index
    %c0_96 = arith.constant 0 : index
    %c0_97 = arith.constant 0 : index
    %117 = vector.load %arg9[%c2_95, %c0_96, %c0_97] : memref<5x1x32xf32, #tpu.memory_space<vmem>>, vector<1x1x32xf32>
    %118 = vector.shape_cast %117 : vector<1x1x32xf32> to vector<1x32xf32>
    %119 = vector.broadcast %118 : vector<1x32xf32> to vector<16x32xf32>
    %120 = arith.addf %116, %119 : vector<16x32xf32>
    %cst_98 = arith.constant 0.000000e+00 : f32
    %121 = vector.broadcast %cst_98 : f32 to vector<16x32xf32>
    %122 = arith.maximumf %120, %121 : vector<16x32xf32>
    %cst_99 = arith.constant dense<0.000000e+00> : vector<2x32xf32>
    %123 = tpu.matmul %1, %99, %cst_99 {dimension_numbers = #tpu.dot_dimension_numbers<[1], [0], [0], [1], [0, 0, 1, 1], [], []>} : vector<2x16xf32>, vector<16x32xf32>, vector<2x32xf32> -> vector<2x32xf32>
    %124 = arith.addf %123, %96 : vector<2x32xf32>
    %c2_100 = arith.constant 2 : index
    %c0_101 = arith.constant 0 : index
    %c0_102 = arith.constant 0 : index
    %125 = vector.load %arg10[%c2_100, %c0_101, %c0_102] : memref<4x32x64xf32, #tpu.memory_space<vmem>>, vector<1x32x64xf32>
    %126 = vector.shape_cast %125 : vector<1x32x64xf32> to vector<32x64xf32>
    %cst_103 = arith.constant dense<0.000000e+00> : vector<2x64xf32>
    %127 = tpu.matmul %124, %126, %cst_103 {dimension_numbers = #tpu.dot_dimension_numbers<[1], [0], [0], [1], [0, 0, 1, 1], [], []>} : vector<2x32xf32>, vector<32x64xf32>, vector<2x64xf32> -> vector<2x64xf32>
    %c2_104 = arith.constant 2 : index
    %c0_105 = arith.constant 0 : index
    %c0_106 = arith.constant 0 : index
    %128 = vector.load %arg11[%c2_104, %c0_105, %c0_106] : memref<4x1x64xf32, #tpu.memory_space<vmem>>, vector<1x1x64xf32>
    %129 = vector.shape_cast %128 : vector<1x1x64xf32> to vector<1x64xf32>
    %130 = vector.broadcast %129 : vector<1x64xf32> to vector<2x64xf32>
    %131 = arith.addf %127, %130 : vector<2x64xf32>
    %cst_107 = arith.constant 0.000000e+00 : f32
    %132 = vector.broadcast %cst_107 : f32 to vector<2x64xf32>
    %133 = arith.maximumf %131, %132 : vector<2x64xf32>
    %c2_108 = arith.constant 2 : index
    %c0_109 = arith.constant 0 : index
    %c0_110 = arith.constant 0 : index
    %134 = vector.load %arg12[%c2_108, %c0_109, %c0_110] : memref<4x64x32xf32, #tpu.memory_space<vmem>>, vector<1x64x32xf32>
    %135 = vector.shape_cast %134 : vector<1x64x32xf32> to vector<64x32xf32>
    %cst_111 = arith.constant dense<0.000000e+00> : vector<2x32xf32>
    %136 = tpu.matmul %133, %135, %cst_111 {dimension_numbers = #tpu.dot_dimension_numbers<[1], [0], [0], [1], [0, 0, 1, 1], [], []>} : vector<2x64xf32>, vector<64x32xf32>, vector<2x32xf32> -> vector<2x32xf32>
    %c2_112 = arith.constant 2 : index
    %c0_113 = arith.constant 0 : index
    %c0_114 = arith.constant 0 : index
    %137 = vector.load %arg13[%c2_112, %c0_113, %c0_114] : memref<4x1x32xf32, #tpu.memory_space<vmem>>, vector<1x1x32xf32>
    %138 = vector.shape_cast %137 : vector<1x1x32xf32> to vector<1x32xf32>
    %139 = vector.broadcast %138 : vector<1x32xf32> to vector<2x32xf32>
    %140 = arith.addf %136, %139 : vector<2x32xf32>
    %cst_115 = arith.constant 0.000000e+00 : f32
    %141 = vector.broadcast %cst_115 : f32 to vector<2x32xf32>
    %142 = arith.maximumf %140, %141 : vector<2x32xf32>
    %c3 = arith.constant 3 : index
    %143 = memref.load %arg0[%c3] : memref<5xf32, #tpu.memory_space<smem>>
    %cst_116 = arith.constant dense<0.000000e+00> : vector<16x32xf32>
    %144 = tpu.matmul %2, %142, %cst_116 {dimension_numbers = #tpu.dot_dimension_numbers<[1], [0], [0], [1], [0, 0, 1, 1], [], []>} : vector<16x2xf32>, vector<2x32xf32>, vector<16x32xf32> -> vector<16x32xf32>
    %145 = arith.addf %122, %144 : vector<16x32xf32>
    %cst_117 = arith.constant dense<0.000000e+00> : vector<16x32xf32>
    %146 = tpu.matmul %0, %145, %cst_117 {dimension_numbers = #tpu.dot_dimension_numbers<[1], [0], [0], [1], [0, 0, 1, 1], [], []>} : vector<16x16xf32>, vector<16x32xf32>, vector<16x32xf32> -> vector<16x32xf32>
    %cst_118 = arith.constant 1.000000e+00 : f32
    %147 = arith.addf %cst_118, %143 : f32
    %148 = vector.broadcast %147 : f32 to vector<16x32xf32>
    %149 = arith.mulf %148, %145 : vector<16x32xf32>
    %150 = arith.addf %149, %146 : vector<16x32xf32>
    %c3_119 = arith.constant 3 : index
    %c0_120 = arith.constant 0 : index
    %c0_121 = arith.constant 0 : index
    %151 = vector.load %arg6[%c3_119, %c0_120, %c0_121] : memref<5x32x64xf32, #tpu.memory_space<vmem>>, vector<1x32x64xf32>
    %152 = vector.shape_cast %151 : vector<1x32x64xf32> to vector<32x64xf32>
    %cst_122 = arith.constant dense<0.000000e+00> : vector<16x64xf32>
    %153 = tpu.matmul %150, %152, %cst_122 {dimension_numbers = #tpu.dot_dimension_numbers<[1], [0], [0], [1], [0, 0, 1, 1], [], []>} : vector<16x32xf32>, vector<32x64xf32>, vector<16x64xf32> -> vector<16x64xf32>
    %c3_123 = arith.constant 3 : index
    %c0_124 = arith.constant 0 : index
    %c0_125 = arith.constant 0 : index
    %154 = vector.load %arg7[%c3_123, %c0_124, %c0_125] : memref<5x1x64xf32, #tpu.memory_space<vmem>>, vector<1x1x64xf32>
    %155 = vector.shape_cast %154 : vector<1x1x64xf32> to vector<1x64xf32>
    %156 = vector.broadcast %155 : vector<1x64xf32> to vector<16x64xf32>
    %157 = arith.addf %153, %156 : vector<16x64xf32>
    %cst_126 = arith.constant 0.000000e+00 : f32
    %158 = vector.broadcast %cst_126 : f32 to vector<16x64xf32>
    %159 = arith.maximumf %157, %158 : vector<16x64xf32>
    %c3_127 = arith.constant 3 : index
    %c0_128 = arith.constant 0 : index
    %c0_129 = arith.constant 0 : index
    %160 = vector.load %arg8[%c3_127, %c0_128, %c0_129] : memref<5x64x32xf32, #tpu.memory_space<vmem>>, vector<1x64x32xf32>
    %161 = vector.shape_cast %160 : vector<1x64x32xf32> to vector<64x32xf32>
    %cst_130 = arith.constant dense<0.000000e+00> : vector<16x32xf32>
    %162 = tpu.matmul %159, %161, %cst_130 {dimension_numbers = #tpu.dot_dimension_numbers<[1], [0], [0], [1], [0, 0, 1, 1], [], []>} : vector<16x64xf32>, vector<64x32xf32>, vector<16x32xf32> -> vector<16x32xf32>
    %c3_131 = arith.constant 3 : index
    %c0_132 = arith.constant 0 : index
    %c0_133 = arith.constant 0 : index
    %163 = vector.load %arg9[%c3_131, %c0_132, %c0_133] : memref<5x1x32xf32, #tpu.memory_space<vmem>>, vector<1x1x32xf32>
    %164 = vector.shape_cast %163 : vector<1x1x32xf32> to vector<1x32xf32>
    %165 = vector.broadcast %164 : vector<1x32xf32> to vector<16x32xf32>
    %166 = arith.addf %162, %165 : vector<16x32xf32>
    %cst_134 = arith.constant 0.000000e+00 : f32
    %167 = vector.broadcast %cst_134 : f32 to vector<16x32xf32>
    %168 = arith.maximumf %166, %167 : vector<16x32xf32>
    %cst_135 = arith.constant dense<0.000000e+00> : vector<2x32xf32>
    %169 = tpu.matmul %1, %145, %cst_135 {dimension_numbers = #tpu.dot_dimension_numbers<[1], [0], [0], [1], [0, 0, 1, 1], [], []>} : vector<2x16xf32>, vector<16x32xf32>, vector<2x32xf32> -> vector<2x32xf32>
    %170 = arith.addf %169, %142 : vector<2x32xf32>
    %c3_136 = arith.constant 3 : index
    %c0_137 = arith.constant 0 : index
    %c0_138 = arith.constant 0 : index
    %171 = vector.load %arg10[%c3_136, %c0_137, %c0_138] : memref<4x32x64xf32, #tpu.memory_space<vmem>>, vector<1x32x64xf32>
    %172 = vector.shape_cast %171 : vector<1x32x64xf32> to vector<32x64xf32>
    %cst_139 = arith.constant dense<0.000000e+00> : vector<2x64xf32>
    %173 = tpu.matmul %170, %172, %cst_139 {dimension_numbers = #tpu.dot_dimension_numbers<[1], [0], [0], [1], [0, 0, 1, 1], [], []>} : vector<2x32xf32>, vector<32x64xf32>, vector<2x64xf32> -> vector<2x64xf32>
    %c3_140 = arith.constant 3 : index
    %c0_141 = arith.constant 0 : index
    %c0_142 = arith.constant 0 : index
    %174 = vector.load %arg11[%c3_140, %c0_141, %c0_142] : memref<4x1x64xf32, #tpu.memory_space<vmem>>, vector<1x1x64xf32>
    %175 = vector.shape_cast %174 : vector<1x1x64xf32> to vector<1x64xf32>
    %176 = vector.broadcast %175 : vector<1x64xf32> to vector<2x64xf32>
    %177 = arith.addf %173, %176 : vector<2x64xf32>
    %cst_143 = arith.constant 0.000000e+00 : f32
    %178 = vector.broadcast %cst_143 : f32 to vector<2x64xf32>
    %179 = arith.maximumf %177, %178 : vector<2x64xf32>
    %c3_144 = arith.constant 3 : index
    %c0_145 = arith.constant 0 : index
    %c0_146 = arith.constant 0 : index
    %180 = vector.load %arg12[%c3_144, %c0_145, %c0_146] : memref<4x64x32xf32, #tpu.memory_space<vmem>>, vector<1x64x32xf32>
    %181 = vector.shape_cast %180 : vector<1x64x32xf32> to vector<64x32xf32>
    %cst_147 = arith.constant dense<0.000000e+00> : vector<2x32xf32>
    %182 = tpu.matmul %179, %181, %cst_147 {dimension_numbers = #tpu.dot_dimension_numbers<[1], [0], [0], [1], [0, 0, 1, 1], [], []>} : vector<2x64xf32>, vector<64x32xf32>, vector<2x32xf32> -> vector<2x32xf32>
    %c3_148 = arith.constant 3 : index
    %c0_149 = arith.constant 0 : index
    %c0_150 = arith.constant 0 : index
    %183 = vector.load %arg13[%c3_148, %c0_149, %c0_150] : memref<4x1x32xf32, #tpu.memory_space<vmem>>, vector<1x1x32xf32>
    %184 = vector.shape_cast %183 : vector<1x1x32xf32> to vector<1x32xf32>
    %185 = vector.broadcast %184 : vector<1x32xf32> to vector<2x32xf32>
    %186 = arith.addf %182, %185 : vector<2x32xf32>
    %cst_151 = arith.constant 0.000000e+00 : f32
    %187 = vector.broadcast %cst_151 : f32 to vector<2x32xf32>
    %188 = arith.maximumf %186, %187 : vector<2x32xf32>
    %c4 = arith.constant 4 : index
    %189 = memref.load %arg0[%c4] : memref<5xf32, #tpu.memory_space<smem>>
    %cst_152 = arith.constant dense<0.000000e+00> : vector<16x32xf32>
    %190 = tpu.matmul %2, %188, %cst_152 {dimension_numbers = #tpu.dot_dimension_numbers<[1], [0], [0], [1], [0, 0, 1, 1], [], []>} : vector<16x2xf32>, vector<2x32xf32>, vector<16x32xf32> -> vector<16x32xf32>
    %191 = arith.addf %168, %190 : vector<16x32xf32>
    %cst_153 = arith.constant dense<0.000000e+00> : vector<16x32xf32>
    %192 = tpu.matmul %0, %191, %cst_153 {dimension_numbers = #tpu.dot_dimension_numbers<[1], [0], [0], [1], [0, 0, 1, 1], [], []>} : vector<16x16xf32>, vector<16x32xf32>, vector<16x32xf32> -> vector<16x32xf32>
    %cst_154 = arith.constant 1.000000e+00 : f32
    %193 = arith.addf %cst_154, %189 : f32
    %194 = vector.broadcast %193 : f32 to vector<16x32xf32>
    %195 = arith.mulf %194, %191 : vector<16x32xf32>
    %196 = arith.addf %195, %192 : vector<16x32xf32>
    %c4_155 = arith.constant 4 : index
    %c0_156 = arith.constant 0 : index
    %c0_157 = arith.constant 0 : index
    %197 = vector.load %arg6[%c4_155, %c0_156, %c0_157] : memref<5x32x64xf32, #tpu.memory_space<vmem>>, vector<1x32x64xf32>
    %198 = vector.shape_cast %197 : vector<1x32x64xf32> to vector<32x64xf32>
    %cst_158 = arith.constant dense<0.000000e+00> : vector<16x64xf32>
    %199 = tpu.matmul %196, %198, %cst_158 {dimension_numbers = #tpu.dot_dimension_numbers<[1], [0], [0], [1], [0, 0, 1, 1], [], []>} : vector<16x32xf32>, vector<32x64xf32>, vector<16x64xf32> -> vector<16x64xf32>
    %c4_159 = arith.constant 4 : index
    %c0_160 = arith.constant 0 : index
    %c0_161 = arith.constant 0 : index
    %200 = vector.load %arg7[%c4_159, %c0_160, %c0_161] : memref<5x1x64xf32, #tpu.memory_space<vmem>>, vector<1x1x64xf32>
    %201 = vector.shape_cast %200 : vector<1x1x64xf32> to vector<1x64xf32>
    %202 = vector.broadcast %201 : vector<1x64xf32> to vector<16x64xf32>
    %203 = arith.addf %199, %202 : vector<16x64xf32>
    %cst_162 = arith.constant 0.000000e+00 : f32
    %204 = vector.broadcast %cst_162 : f32 to vector<16x64xf32>
    %205 = arith.maximumf %203, %204 : vector<16x64xf32>
    %c4_163 = arith.constant 4 : index
    %c0_164 = arith.constant 0 : index
    %c0_165 = arith.constant 0 : index
    %206 = vector.load %arg8[%c4_163, %c0_164, %c0_165] : memref<5x64x32xf32, #tpu.memory_space<vmem>>, vector<1x64x32xf32>
    %207 = vector.shape_cast %206 : vector<1x64x32xf32> to vector<64x32xf32>
    %cst_166 = arith.constant dense<0.000000e+00> : vector<16x32xf32>
    %208 = tpu.matmul %205, %207, %cst_166 {dimension_numbers = #tpu.dot_dimension_numbers<[1], [0], [0], [1], [0, 0, 1, 1], [], []>} : vector<16x64xf32>, vector<64x32xf32>, vector<16x32xf32> -> vector<16x32xf32>
    %c4_167 = arith.constant 4 : index
    %c0_168 = arith.constant 0 : index
    %c0_169 = arith.constant 0 : index
    %209 = vector.load %arg9[%c4_167, %c0_168, %c0_169] : memref<5x1x32xf32, #tpu.memory_space<vmem>>, vector<1x1x32xf32>
    %210 = vector.shape_cast %209 : vector<1x1x32xf32> to vector<1x32xf32>
    %211 = vector.broadcast %210 : vector<1x32xf32> to vector<16x32xf32>
    %212 = arith.addf %208, %211 : vector<16x32xf32>
    %c0_170 = arith.constant 0 : index
    %c0_171 = arith.constant 0 : index
    %213 = vector.load %arg4[%c0_170, %c0_171] : memref<2x16xf32, #tpu.memory_space<vmem>>, vector<2x16xf32>
    %cst_172 = arith.constant dense<0.000000e+00> : vector<2x32xf32>
    %214 = tpu.matmul %213, %212, %cst_172 {dimension_numbers = #tpu.dot_dimension_numbers<[1], [0], [0], [1], [0, 0, 1, 1], [], []>} : vector<2x16xf32>, vector<16x32xf32>, vector<2x32xf32> -> vector<2x32xf32>
    %c0_173 = arith.constant 0 : index
    %c0_174 = arith.constant 0 : index
    %215 = vector.load %arg14[%c0_173, %c0_174] : memref<32x4xf32, #tpu.memory_space<vmem>>, vector<32x4xf32>
    %cst_175 = arith.constant dense<0.000000e+00> : vector<2x4xf32>
    %216 = tpu.matmul %214, %215, %cst_175 {dimension_numbers = #tpu.dot_dimension_numbers<[1], [0], [0], [1], [0, 0, 1, 1], [], []>} : vector<2x32xf32>, vector<32x4xf32>, vector<2x4xf32> -> vector<2x4xf32>
    %c0_176 = arith.constant 0 : index
    %c0_177 = arith.constant 0 : index
    %217 = vector.load %arg15[%c0_176, %c0_177] : memref<1x4xf32, #tpu.memory_space<vmem>>, vector<1x4xf32>
    %218 = vector.broadcast %217 : vector<1x4xf32> to vector<2x4xf32>
    %219 = arith.addf %216, %218 : vector<2x4xf32>
    %c0_178 = arith.constant 0 : index
    %c0_179 = arith.constant 0 : index
    %220 = vector.load %arg16[%c0_178, %c0_179] : memref<2x4xf32, #tpu.memory_space<vmem>>, vector<2x4xf32>
    tpu.vector_store %arg16[%c0_178, %c0_179], %219 {strides = array<i32>} : memref<2x4xf32, #tpu.memory_space<vmem>>, vector<2x4xf32>,
    return
  }
}

</mosaic_0001>

<bundles_post_ra>
// kernel: tpu_custom_call.1
= control target key start
LH: loop header
LB: loop body
LE: loop exit
PB: predicated region body
PF: predicated region fallthrough
CT: control target
= control target key end

     0   :  { %s4757_s0 = inlined_call_operand.vmem [shape: f32[5], index: 0, kind: input, shape index: {}]   ;;  %s4758_s1 = inlined_call_operand.vmem [shape: f32[16,16], index: 1, kind: input, shape index: {}]   ;;  %s4759_s2 = inlined_call_operand.vmem [shape: f32[2,16], index: 2, kind: input, shape index: {}]   ;;  %s4760_s3 = inlined_call_operand.vmem [shape: f32[16,2], index: 3, kind: input, shape index: {}]   ;;  %s4761_s4 = inlined_call_operand.vmem [shape: f32[2,16], index: 4, kind: input, shape index: {}]   ;;  %s4762_s5 = inlined_call_operand.vmem [shape: f32[16,32], index: 5, kind: input, shape index: {}]   ;;  %s4763_s6 = inlined_call_operand.vmem [shape: f32[5,32,64], index: 6, kind: input, shape index: {}]   ;;  %s4764_s7 = inlined_call_operand.vmem [shape: f32[5,1,64], index: 7, kind: input, shape index: {}]   ;;  %s4765_s8 = inlined_call_operand.vmem [shape: f32[5,64,32], index: 8, kind: input, shape index: {}]   ;;  %s4766_s9 = inlined_call_operand.vmem [shape: f32[5,1,32], index: 9, kind: input, shape index: {}]   ;;  %s4767_s10 = inlined_call_operand.vmem [shape: f32[4,32,64], index: 10, kind: input, shape index: {}]   ;;  %s4768_s11 = inlined_call_operand.vmem [shape: f32[4,1,64], index: 11, kind: input, shape index: {}]   ;;  %s4769_s12 = inlined_call_operand.vmem [shape: f32[4,64,32], index: 12, kind: input, shape index: {}]   ;;  %s4770_s13 = inlined_call_operand.vmem [shape: f32[4,1,32], index: 13, kind: input, shape index: {}]   ;;  %s4771_s14 = inlined_call_operand.vmem [shape: f32[32,4], index: 14, kind: input, shape index: {}]   ;;  %s4772_s15 = inlined_call_operand.vmem [shape: f32[1,4], index: 15, kind: input, shape index: {}]   ;;  %s4773_s16 = inlined_call_operand.hbm [shape: f32[2,4], index: 16, kind: output, shape index: {}]  }
   0x1   :  { %4774 = sst [smem:[#allocation8_spill]] %s4757_s0 }
   0x2   :  { %21 = vsyncpa [#allocation4], 0 }
   0x3   :  { %22 = vsyncpa [#allocation3], 0  ;;  %s4775_s23 = sld [smem:[#allocation8_spill]] }
   0x9   :  { %s29_s24 = sshll.u32 %s4775_s23, 4  ;;  %s30_s24 = int_to_ptr.vmem [resolvable:$true] %s29_s24 }
   0xa   :  { %s4025_s25 = scalar_lea.vmem %s30_s24, 16  ;;  %p4030_p1 = scmp.lt.s32.totalorder %s30_s24, %s30_s24 }
   0xb   :  { %p4026_p0 = scmp.ne.s32.totalorder %s30_s24, %s4025_s25  ;;  %p4031_p2 = scmp.lt.s32.totalorder %s4025_s25, %s4025_s25 }
   0xd   :  { %p4032_p3 = por %p4031_p2, %p4030_p1 }
   0xf   :  { %p4033_p4 = pnand %p4032_p3, %p4026_p0 }
  0x11   :  { %4036 = shalt.err (!%p4033_p4)
}
  0x12   :  { %s4063_s26 = smov [#allocation2]  }
  0x13   :  { %32 = dma.vmem_to_smem %s30_s24, 16, %s4063_s26, [#allocation4]  }
  0x14   :  { %4059 = dma.done.wait [#allocation4], 16  }
  0x15   :  { %4060 = vsyncadd [#allocation4], 4294967280 }
  0x16   :  { %66 = sfence }
  0x17   :  { %v4159_v0 = vld [vmem:[%s4760_s3] sm:$0xff]  ;;  %vm75_vm0 = vcmask 15360   ;;  %v4164_v1 = vld [vmem:[%s4760_s3 + $0x8] sm:$0xff]  ;;  %v4064_v2 = vmov 0.0   ;;  %vm163_vm1 = vcmask 130048   ;;  %v253_v15 = vld [vmem:[%s4763_s6 + $0x10] sm:$0xff] }
  0x18   :  { %3411 = vmatprep.subr.mxu0 %v4064_v2  ;;  %3413 = vmatprep.mubr.msk.f32.mxu0 %vm75_vm0, %v4159_v0  ;;  %v4175_v3 = vld [vmem:[%s4758_s1] sm:$0xff]  ;;  %v252_v5 = vld [vmem:[%s4763_s6 + $0x8] sm:$0xff]  ;;  %v254_v16 = vld [vmem:[%s4763_s6 + $0x18] sm:$0xff]  ;;  %v4065_v18 = vmov 0.0|0.0   ;;  %s74_s25 = sld [smem:[#allocation2]]  ;;  %vm262_vm2 = vcmask 261120  }
  0x19   :  { %3412 = vmatpush3.msra.mxu0 %v4064_v2  ;;  %3420 = vmatprep.mubr.msk.f32.mxu1 %vm163_vm1, %v4175_v3  ;;  %v251_v4 = vld [vmem:[%s4763_s6] sm:$0xff]  ;;  %v73_v7 = vld [vmem:[%s4762_s5 + $0x8] sm:$0xff]  ;;  %v3795_v17 = vpack.c.bf16 %v254_v16, %v253_v15  ;;  %v348_v21 = vld [vmem:[%s4765_s8 + $0x10] sm:$0xff]  ;;  %vm4066_vm3 = vmmov 0   ;;  %vm361_vm4 = vcmask 523264   ;;  %vm82_vm5 = vcmask 1041408  }
  0x1a   :  { %3414 = vmatmul.mubr.msk.f32.vlgmr.msra.gmra.mrb[0].mxu0 %vm75_vm0, %v4164_v1  ;;  %v3791_v6 = vpack.c.bf16 %v252_v5, %v251_v4  ;;  %v72_v8 = vld [vmem:[%s4762_s5] sm:$0xff]  ;;  %v4194_v14 = vld [vmem:[%s4758_s1 + $0x8] sm:$0xff]  ;;  %v349_v23 = vld [vmem:[%s4765_s8 + $0x18] sm:$0xff]  ;;  %s3056_s28 = sld [smem:[#allocation2 + $0x1]]  ;;  %s4067_s20 = smov [#allocation5]   ;;  %vm3024_vm6 = vcmask 25600  }
  0x1b   :  { %v346_v19 = vld [vmem:[%s4765_s8] sm:$0xff]  ;;  %v347_v20 = vld [vmem:[%s4765_s8 + $0x8] sm:$0xff]  ;;  %v3803_v24 = vpack.c.bf16 %v349_v23, %v348_v21  ;;  %v520_v39 = vld [vmem:[%s4767_s10 + $0x10] sm:$0xff] }
  0x1c   :  { %3792 = vmatprep.subr.bf16.mxu0 %v3791_v6  ;;  %v3799_v22 = vpack.c.bf16 %v347_v20, %v346_v19  ;;  %v350_v25 = vld [vmem:[%s4765_s8 + $0x20] sm:$0xff]  ;;  %v351_v26 = vld [vmem:[%s4765_s8 + $0x28] sm:$0xff]  ;;  %v521_v40 = vld [vmem:[%s4767_s10 + $0x18] sm:$0xff] }
  0x1d   :  { %3794 = vmatpush3.bf16.msra.mxu0 %v3791_v6  ;;  %v3807_v27 = vpack.c.bf16 %v351_v26, %v350_v25  ;;  %v518_v35 = vld [vmem:[%s4767_s10] sm:$0xff]  ;;  %v519_v36 = vld [vmem:[%s4767_s10 + $0x8] sm:$0xff]  ;;  %v3822_v41 = vpack.c.bf16 %v521_v40, %v520_v39  ;;  %v352_v42 = vld [vmem:[%s4765_s8 + $0x30] sm:$0xff] }
  0x1e   :  { %3796 = vmatprep.subr.bf16.mxu0 %v3795_v17  ;;  %s245_s26 = sadd.f32 1.0, %s74_s25  ;;  %v4236_v37 = vld [vmem:[%s4759_s2] sm:$0x3]  ;;  %v3819_v38 = vpack.c.bf16 %v519_v36, %v518_v35  ;;  %v353_v43 = vld [vmem:[%s4765_s8 + $0x38] sm:$0xff]  ;;  %v604_v50 = vld [vmem:[%s4769_s12 + $0x8] sm:$0xff]  ;;  %s3191_s25 = sld [smem:[#allocation2 + $0x4]] }
  0x1f   :  { %v3811_v44 = vpack.c.bf16 %v353_v43, %v352_v42  ;;  %v3045_v45 = vld [vmem:[%s4764_s7] ss:$0 sm:$0xff]  ;;  %v605_v57 = vld [vmem:[%s4769_s12 + $0x10] sm:$0xff]  ;;  %v606_v58 = vld [vmem:[%s4769_s12 + $0x18] sm:$0xff] }
  0x20   :  { %v246_v28 = vstv %s245_s26  ;;  %v603_v49 = vld [vmem:[%s4769_s12] sm:$0xff]  ;;  %v3828_v59 = vpack.c.bf16 %v606_v58, %v605_v57  ;;  %v608_v61 = vld [vmem:[%s4769_s12 + $0x28] sm:$0xff]  ;;  %v609_v63 = vld [vmem:[%s4769_s12 + $0x30] sm:$0xff]  ;;  %s848_s5 = sadd.f32 1.0, %s3056_s28 }
  0x21   :  { %3798 = vmatpush3.bf16.msra.mxu0 %v3795_v17  ;;  %v3825_v54 = vpack.c.bf16 %v604_v50, %v603_v49  ;;  %v607_v60 = vld [vmem:[%s4769_s12 + $0x20] sm:$0xff]  ;;  %v610_v4 = vld [vmem:[%s4769_s12 + $0x38] sm:$0xff]  ;;  %v3072_v39 = vld [vmem:[%s4765_s8 + $0x50] sm:$0xff] }
  0x22   :  { %3815 = vmatprep.subr.bf16.mxu0 %v4065_v18  ;;  %v3831_v62 = vpack.c.bf16 %v608_v61, %v607_v60  ;;  %v3834_v5 = vpack.c.bf16 %v610_v4, %v609_v63  ;;  %v3052_v6 = vld [vmem:[%s4768_s11] ss:$0 sm:$0xff]  ;;  %v3077_v57 = vld [vmem:[%s4765_s8 + $0x78] sm:$0xff] }
  0x23   :  { %v3048_v20 = vld [vmem:[%s4766_s9] ss:$0 sm:$0xff]  ;;  %v3086_v60 = vld [vmem:[%s4767_s10 + $0x38] sm:$0xff] }
  0x24   :  { %v3070_v36 = vld [vmem:[%s4765_s8 + $0x40] sm:$0xff]  ;;  %s2666_s26 = sadd.f32 1.0, %s3191_s25 }
  0x25   :  { %v3074_v43 = vld [vmem:[%s4765_s8 + $0x60] sm:$0xff] }
  0xed   :  { %v3415_v9 = vpop.f32.mrb[0].mxu0 }
  0xee   :  { %v162_v10 = vadd.f32 %v3415_v9, %v73_v7  ;;  %v152_v11 = vpop.f32.mrb[1].mxu0 }
  0xef   :  { %v161_v12 = vadd.f32 %v152_v11, %v72_v8 }
  0xf0   :  { %v248_v29 = vmul.f32 %v246_v28, %v162_v10 }
  0xf1   :  { %v3787_v13 = vpack.c.bf16 %v162_v10, %v161_v12  ;;  %v247_v31 = vmul.f32 %v246_v28, %v161_v12  ;;  %v3062_v28 = vld [vmem:[%s4763_s6 + $0x20] sm:$0xff] }
  0xf3   :  { %3788 = vmatprep.subr.bf16.mxu1 %v3787_v13 }
  0xf4   :  { %3790 = vmatpush3.bf16.msra.mxu1 %v3787_v13 }
  0xf5   :  { %3800 = vmatprep.subr.bf16.mxu1 %v3799_v22 }
  0xf7   :  { %3421 = vmatmul.mubr.msk.f32.vlgmr.msra.gmra.mrb[0].mxu1 %vm163_vm1, %v4194_v14 }
  0xf8   :  { %3802 = vmatpush3.bf16.msra.mxu1 %v3799_v22 }
  0xf9   :  { %3804 = vmatprep.subr.bf16.mxu1 %v3803_v24 }
  0xfc   :  { %3806 = vmatpush3.bf16.msra.mxu1 %v3803_v24 }
  0xfd   :  { %3808 = vmatprep.subr.bf16.mxu1 %v3807_v27 }
 0x100   :  { %3810 = vmatpush3.bf16.msra.mxu1 %v3807_v27 }
 0x101   :  { %3812 = vmatprep.subr.bf16.mxu1 %v3811_v44 }
 0x104   :  { %3814 = vmatpush3.bf16.msra.mxu1 %v3811_v44  ;;  %v3075_v44 = vld [vmem:[%s4765_s8 + $0x68] sm:$0xff] }
 0x105   :  { %3824 = vmatprep.subr.bf16.mxu1 %v4065_v18 }
 0x1ca   :  { %v3422_v30 = vpop.f32.mrb[0].mxu1 }
 0x1cb   :  { %v250_v32 = vadd.f32 %v3422_v30, %v248_v29  ;;  %v236_v33 = vpop.f32.mrb[1].mxu1  ;;  %v3063_v29 = vld [vmem:[%s4763_s6 + $0x28] sm:$0xff] }
 0x1cc   :  { %v249_v34 = vadd.f32 %v247_v31, %v236_v33  ;;  %v3064_v33 = vld [vmem:[%s4763_s6 + $0x30] sm:$0xff] }
 0x1ce   :  { %3431 = vmatprep.mubr.msk.f32.mxu0 %vm262_vm2, %v249_v34  ;;  %v3065_v34 = vld [vmem:[%s4763_s6 + $0x38] sm:$0xff] }
 0x1cf   :  { %3432 = vmatmul.mubr.msk.f32.vlgmr.msra.gmra.mrb[2].mxu0 %vm262_vm2, %v250_v32  ;;  %v3840_v32 = vpack.c.bf16 %v3063_v29, %v3062_v28  ;;  %v3844_v35 = vpack.c.bf16 %v3065_v34, %v3064_v33  ;;  %v3099_v33 = vld [vmem:[%s4770_s13 + $0x1] ss:$0 sm:$0xff] }
 0x1d0   :  { %3817 = vmatpush3.bf16.msra.mxu0 %v3787_v13  ;;  %3457 = vmatprep.mubr.msk.f32.mxu0 %vm4066_vm3, %v4064_v2  ;;  %v3054_v13 = vld [vmem:[%s4770_s13] ss:$0 sm:$0xff] }
 0x1d1   :  { %3818 = vmatprep.subr.bf16.mxu0 %v4065_v18 }
 0x1d3   :  { %3458 = vmatmul.mubr.msk.f32.vlgmr.msra.gmra.mrb[4].mxu0 %vm163_vm1, %v4236_v37 }
 0x1d4   :  { %3820 = vmatpush3.bf16.msra.mxu0 %v3819_v38  ;;  %3468 = vmatprep.mubr.msk.f32.mxu0 %vm4066_vm3, %v4064_v2  ;;  %v3071_v38 = vld [vmem:[%s4765_s8 + $0x48] sm:$0xff] }
 0x1d5   :  { %3821 = vmatprep.subr.bf16.mxu0 %v4065_v18  ;;  %v3848_v40 = vpack.c.bf16 %v3071_v38, %v3070_v36 }
 0x1d8   :  { %3823 = vmatpush3.bf16.msra.mxu0 %v3822_v41  ;;  %v3073_v41 = vld [vmem:[%s4765_s8 + $0x58] sm:$0xff] }
 0x1d9   :  { %v3852_v42 = vpack.c.bf16 %v3073_v41, %v3072_v39  ;;  %v3079_v39 = vld [vmem:[%s4766_s9 + $0x1] ss:$0 sm:$0xff] }
 0x2a2   :  { %v3433_v46 = vpop.f32.mrb[2].mxu0 }
 0x2a3   :  { %v341_v47 = vadd.f32 %v3433_v46, %v3045_v45  ;;  %v335_v48 = vpop.f32.mrb[3].mxu0  ;;  %v849_v46 = vstv %s848_s5  ;;  %s3101_s5 = sld [smem:[#allocation2 + $0x2]] }
 0x2a4   :  { %v336_v51 = vadd.f32 %v3045_v45, %v335_v48  ;;  %v3856_v45 = vpack.c.bf16 %v3075_v44, %v3074_v43 }
 0x2a5   :  { %v345_v55 = vmax.f32 %v341_v47, 0.0 }
 0x2a6   :  { %v344_v52 = vmax.f32 %v336_v51, 0.0  ;;  %v514_v53 = vpop.f32.mrb[4].mxu0 }
 0x2a7   :  { %v3459_v56 = vpop.f32.mrb[5].mxu0  ;;  %3469 = vmatmul.mubr.msk.f32.vlgmr.msra.gmra.mrb[6].mxu0 %vm262_vm2, %v514_v53  ;;  %v3083_v53 = vld [vmem:[%s4767_s10 + $0x20] sm:$0xff] }
 0x2a8   :  { %3450 = vmatprep.mubr.msk.f32.mxu1 %vm361_vm4, %v344_v52  ;;  %3492 = vmatprep.mubr.msk.f32.mxu0 %vm75_vm0, %v4159_v0  ;;  %v3076_v56 = vld [vmem:[%s4765_s8 + $0x70] sm:$0xff] }
 0x2a9   :  { %3451 = vmatmul.mubr.msk.f32.vlgmr.msra.gmra.mrb[2].mxu1 %vm361_vm4, %v345_v55  ;;  %v3860_v58 = vpack.c.bf16 %v3077_v57, %v3076_v56  ;;  %v3116_v56 = vld [vmem:[%s4765_s8 + $0x88] sm:$0xff]  ;;  %v3117_v57 = vld [vmem:[%s4765_s8 + $0x90] sm:$0xff]  ;;  %s1454_s29 = sadd.f32 1.0, %s3101_s5 }
 0x2aa   :  { %3826 = vmatpush3.bf16.msra.mxu1 %v3825_v54  ;;  %3487 = vmatprep.mubr.msk.f32.mxu1 %vm4066_vm3, %v4064_v2  ;;  %v3084_v54 = vld [vmem:[%s4767_s10 + $0x28] sm:$0xff] }
 0x2ab   :  { %3827 = vmatprep.subr.bf16.mxu1 %v4065_v18  ;;  %v3868_v55 = vpack.c.bf16 %v3084_v54, %v3083_v53  ;;  %v3110_v53 = vld [vmem:[%s4763_s6 + $0x58] sm:$0xff] }
 0x2ae   :  { %3829 = vmatpush3.bf16.msra.mxu1 %v3828_v59  ;;  %v3085_v59 = vld [vmem:[%s4767_s10 + $0x30] sm:$0xff] }
 0x2af   :  { %3830 = vmatprep.subr.bf16.mxu1 %v4065_v18  ;;  %v3871_v61 = vpack.c.bf16 %v3086_v60, %v3085_v59  ;;  %v3118_v59 = vld [vmem:[%s4765_s8 + $0x98] sm:$0xff] }
 0x2b0   :  { %v3901_v60 = vpack.c.bf16 %v3118_v59, %v3117_v57  ;;  %v3124_v57 = vld [vmem:[%s4766_s9 + $0x2] ss:$0 sm:$0xff] }
 0x2b2   :  { %3832 = vmatpush3.bf16.msra.mxu1 %v3831_v62  ;;  %v3067_v62 = vld [vmem:[%s4764_s7 + $0x1] ss:$0 sm:$0xff] }
 0x2b3   :  { %3833 = vmatprep.subr.bf16.mxu1 %v4065_v18 }
 0x2b6   :  { %3835 = vmatpush3.bf16.msra.mxu1 %v3834_v5 }
 0x2b7   :  { %3849 = vmatprep.subr.bf16.mxu1 %v3848_v40 }
 0x37a   :  { %v598_v7 = vpop.f32.mrb[6].mxu0 }
 0x37b   :  { %v599_v8 = vadd.f32 %v3052_v6, %v598_v7  ;;  %v3470_v9 = vpop.f32.mrb[7].mxu0  ;;  %v3090_v6 = vld [vmem:[%s4769_s12 + $0x40] sm:$0xff]  ;;  %v3091_v7 = vld [vmem:[%s4769_s12 + $0x48] sm:$0xff] }
 0x37c   :  { %v3452_v10 = vpop.f32.mrb[2].mxu1 }
 0x37d   :  { %v602_v11 = vmax.f32 %v599_v8, 0.0  ;;  %v434_v12 = vpop.f32.mrb[3].mxu1  ;;  %v440_v21 = vadd.f32 %v3452_v10, %v3048_v20 }
 0x37e   :  { %v435_v22 = vadd.f32 %v3048_v20, %v434_v12 }
 0x37f   :  { %3488 = vmatmul.mubr.msk.f32.vlgmr.msra.gmra.mrb[4].mxu1 %vm361_vm4, %v602_v11  ;;  %v444_v23 = vmax.f32 %v440_v21, 0.0  ;;  %v3874_v11 = vpack.c.bf16 %v3091_v7, %v3090_v6  ;;  %v3095_v21 = vld [vmem:[%s4769_s12 + $0x68] sm:$0xff] }
 0x380   :  { %v443_v24 = vmax.f32 %v435_v22, 0.0  ;;  %3851 = vmatpush3.bf16.msra.mxu1 %v3848_v40 }
 0x381   :  { %3853 = vmatprep.subr.bf16.mxu1 %v3852_v42 }
 0x384   :  { %3855 = vmatpush3.bf16.msra.mxu1 %v3852_v42 }
 0x385   :  { %3857 = vmatprep.subr.bf16.mxu1 %v3856_v45 }
 0x388   :  { %3859 = vmatpush3.bf16.msra.mxu1 %v3856_v45 }
 0x389   :  { %3861 = vmatprep.subr.bf16.mxu1 %v3860_v58 }
 0x38c   :  { %3863 = vmatpush3.bf16.msra.mxu1 %v3860_v58 }
 0x452   :  { %v687_v15 = vpop.f32.mrb[4].mxu1 }
 0x453   :  { %v688_v16 = vadd.f32 %v3054_v13, %v687_v15  ;;  %v3489_v17 = vpop.f32.mrb[5].mxu1 }
 0x454   :  { %v3093_v17 = vld [vmem:[%s4769_s12 + $0x58] sm:$0xff] }
 0x455   :  { %v4301_v19 = vmax.f32 %v688_v16, 0.0  ;;  %v3092_v16 = vld [vmem:[%s4769_s12 + $0x50] sm:$0xff] }
 0x456   :  { %v3877_v20 = vpack.c.bf16 %v3093_v17, %v3092_v16  ;;  %v3122_v16 = vld [vmem:[%s4765_s8 + $0xb8] sm:$0xff] }
 0x457   :  { %3490 = vmatprep.subr.msk.mxu0 %vm82_vm5, %v4301_v19 }
 0x458   :  { %3491 = vmatpush3.msk.msra.mxu0 %vm82_vm5, %v4301_v19 }
 0x459   :  { %3493 = vmatmul.mubr.msk.f32.vlgmr.msra.gmra.mrb[8].mxu0 %vm75_vm0, %v4164_v1 }
 0x45a   :  { %3499 = vmatprep.mubr.msk.f32.mxu0 %vm163_vm1, %v4175_v3 }
 0x52c   :  { %v3494_v25 = vpop.f32.mrb[8].mxu0 }
 0x52d   :  { %v772_v26 = vadd.f32 %v3494_v25, %v444_v23  ;;  %v762_v27 = vpop.f32.mrb[9].mxu0  ;;  %v3096_v23 = vld [vmem:[%s4769_s12 + $0x70] sm:$0xff] }
 0x52e   :  { %v771_v30 = vadd.f32 %v762_v27, %v443_v24  ;;  %v3097_v24 = vld [vmem:[%s4769_s12 + $0x78] sm:$0xff] }
 0x52f   :  { %v851_v47 = vmul.f32 %v849_v46, %v772_v26  ;;  %v3883_v25 = vpack.c.bf16 %v3097_v24, %v3096_v23 }
 0x530   :  { %v3836_v31 = vpack.c.bf16 %v772_v26, %v771_v30  ;;  %v850_v49 = vmul.f32 %v849_v46, %v771_v30  ;;  %v3088_v26 = vld [vmem:[%s4768_s11 + $0x1] ss:$0 sm:$0xff] }
 0x532   :  { %3837 = vmatprep.subr.bf16.mxu0 %v3836_v31 }
 0x533   :  { %3839 = vmatpush3.bf16.msra.mxu0 %v3836_v31 }
 0x534   :  { %3841 = vmatprep.subr.bf16.mxu0 %v3840_v32 }
 0x536   :  { %3500 = vmatmul.mubr.msk.f32.vlgmr.msra.gmra.mrb[10].mxu0 %vm163_vm1, %v4194_v14 }
 0x537   :  { %3843 = vmatpush3.bf16.msra.mxu0 %v3840_v32 }
 0x538   :  { %3845 = vmatprep.subr.bf16.mxu0 %v3844_v35 }
 0x53b   :  { %3847 = vmatpush3.bf16.msra.mxu0 %v3844_v35 }
 0x53c   :  { %3864 = vmatprep.subr.bf16.mxu0 %v4065_v18 }
 0x609   :  { %v3501_v48 = vpop.f32.mrb[10].mxu0 }
 0x60a   :  { %v853_v50 = vadd.f32 %v3501_v48, %v851_v47  ;;  %v839_v51 = vpop.f32.mrb[11].mxu0  ;;  %v3107_v47 = vld [vmem:[%s4763_s6 + $0x40] sm:$0xff]  ;;  %v3108_v48 = vld [vmem:[%s4763_s6 + $0x48] sm:$0xff] }
 0x60b   :  { %v852_v52 = vadd.f32 %v850_v49, %v839_v51  ;;  %v3889_v51 = vpack.c.bf16 %v3108_v48, %v3107_v47 }
 0x60d   :  { %3510 = vmatprep.mubr.msk.f32.mxu0 %vm262_vm2, %v852_v52  ;;  %v3109_v52 = vld [vmem:[%s4763_s6 + $0x50] sm:$0xff] }
 0x60e   :  { %3511 = vmatmul.mubr.msk.f32.vlgmr.msra.gmra.mrb[12].mxu0 %vm262_vm2, %v853_v50  ;;  %v3893_v54 = vpack.c.bf16 %v3110_v53, %v3109_v52  ;;  %v3144_v52 = vld [vmem:[%s4770_s13 + $0x2] ss:$0 sm:$0xff] }
 0x60f   :  { %3866 = vmatpush3.bf16.msra.mxu0 %v3836_v31  ;;  %3536 = vmatprep.mubr.msk.f32.mxu0 %vm4066_vm3, %v4064_v2 }
 0x610   :  { %3867 = vmatprep.subr.bf16.mxu0 %v4065_v18 }
 0x612   :  { %3537 = vmatmul.mubr.msk.f32.vlgmr.msra.gmra.mrb[14].mxu0 %vm163_vm1, %v4236_v37 }
 0x613   :  { %3547 = vmatprep.mubr.msk.f32.mxu0 %vm4066_vm3, %v4064_v2  ;;  %3869 = vmatpush3.bf16.msra.mxu0 %v3868_v55  ;;  %v3115_v55 = vld [vmem:[%s4765_s8 + $0x80] sm:$0xff] }
 0x614   :  { %3870 = vmatprep.subr.bf16.mxu0 %v4065_v18  ;;  %v3897_v58 = vpack.c.bf16 %v3116_v56, %v3115_v55 }
 0x617   :  { %3872 = vmatpush3.bf16.msra.mxu0 %v3871_v61  ;;  %v3119_v61 = vld [vmem:[%s4765_s8 + $0xa0] sm:$0xff] }
 0x618   :  { %3873 = vmatprep.subr.bf16.mxu0 %v4065_v18 }
 0x6e1   :  { %v3512_v63 = vpop.f32.mrb[12].mxu0 }
 0x6e2   :  { %v945_v4 = vadd.f32 %v3512_v63, %v3067_v62  ;;  %v939_v5 = vpop.f32.mrb[13].mxu0 }
 0x6e3   :  { %v940_v8 = vadd.f32 %v3067_v62, %v939_v5  ;;  %v3120_v62 = vld [vmem:[%s4765_s8 + $0xa8] sm:$0xff] }
 0x6e4   :  { %v949_v12 = vmax.f32 %v945_v4, 0.0  ;;  %v3905_v63 = vpack.c.bf16 %v3120_v62, %v3119_v61  ;;  %v1455_v4 = vstv %s1454_s29  ;;  %s3146_s29 = sld [smem:[#allocation2 + $0x3]] }
 0x6e5   :  { %v948_v9 = vmax.f32 %v940_v8, 0.0  ;;  %v1116_v10 = vpop.f32.mrb[14].mxu0 }
 0x6e6   :  { %v1117_v13 = vadd.f32 %v1116_v10, %v4301_v19  ;;  %v3538_v15 = vpop.f32.mrb[15].mxu0  ;;  %v3094_v19 = vld [vmem:[%s4769_s12 + $0x60] sm:$0xff] }
 0x6e7   :  { %3529 = vmatprep.mubr.msk.f32.mxu1 %vm361_vm4, %v948_v9  ;;  %v3880_v22 = vpack.c.bf16 %v3095_v21, %v3094_v19  ;;  %v3121_v15 = vld [vmem:[%s4765_s8 + $0xb0] sm:$0xff]  ;;  %v3131_v19 = vld [vmem:[%s4767_s10 + $0x58] sm:$0xff] }
 0x6e8   :  { %3530 = vmatmul.mubr.msk.f32.vlgmr.msra.gmra.mrb[6].mxu1 %vm361_vm4, %v949_v12  ;;  %3548 = vmatmul.mubr.msk.f32.vlgmr.msra.gmra.mrb[16].mxu0 %vm262_vm2, %v1117_v13  ;;  %v3129_v12 = vld [vmem:[%s4767_s10 + $0x48] sm:$0xff]  ;;  %v3909_v17 = vpack.c.bf16 %v3122_v16, %v3121_v15  ;;  %v3162_v16 = vld [vmem:[%s4765_s8 + $0xd0] sm:$0xff] }
 0x6e9   :  { %3875 = vmatpush3.bf16.msra.mxu0 %v3874_v11  ;;  %3566 = vmatprep.mubr.msk.f32.mxu0 %vm4066_vm3, %v4064_v2  ;;  %v3128_v11 = vld [vmem:[%s4767_s10 + $0x40] sm:$0xff]  ;;  %v3161_v15 = vld [vmem:[%s4765_s8 + $0xc8] sm:$0xff] }
 0x6ea   :  { %3876 = vmatprep.subr.bf16.mxu0 %v4065_v18  ;;  %3571 = vmatprep.mubr.msk.f32.mxu1 %vm75_vm0, %v4159_v0  ;;  %v3917_v13 = vpack.c.bf16 %v3129_v12, %v3128_v11  ;;  %v3155_v11 = vld [vmem:[%s4763_s6 + $0x78] sm:$0xff]  ;;  %s2060_s30 = sadd.f32 1.0, %s3146_s29 }
 0x6ed   :  { %3878 = vmatpush3.bf16.msra.mxu0 %v3877_v20  ;;  %v3130_v20 = vld [vmem:[%s4767_s10 + $0x50] sm:$0xff] }
 0x6ee   :  { %3879 = vmatprep.subr.bf16.mxu0 %v4065_v18  ;;  %v3920_v21 = vpack.c.bf16 %v3131_v19, %v3130_v20  ;;  %v3163_v20 = vld [vmem:[%s4765_s8 + $0xd8] sm:$0xff] }
 0x6ef   :  { %v3950_v19 = vpack.c.bf16 %v3163_v20, %v3162_v16 }
 0x6f1   :  { %3881 = vmatpush3.bf16.msra.mxu0 %v3880_v22  ;;  %v3112_v22 = vld [vmem:[%s4764_s7 + $0x2] ss:$0 sm:$0xff] }
 0x6f2   :  { %3882 = vmatprep.subr.bf16.mxu0 %v4065_v18 }
 0x6f5   :  { %3884 = vmatpush3.bf16.msra.mxu0 %v3883_v25 }
 0x6f6   :  { %3898 = vmatprep.subr.bf16.mxu0 %v3897_v58 }
 0x7bb   :  { %v3531_v27 = vpop.f32.mrb[6].mxu1  ;;  %v1202_v28 = vpop.f32.mrb[16].mxu0 }
 0x7bc   :  { %v1203_v29 = vadd.f32 %v3088_v26, %v1202_v28  ;;  %v1039_v30 = vpop.f32.mrb[7].mxu1  ;;  %v3549_v31 = vpop.f32.mrb[17].mxu0  ;;  %v1045_v40 = vadd.f32 %v3531_v27, %v3079_v39  ;;  %v3135_v26 = vld [vmem:[%s4769_s12 + $0x80] sm:$0xff]  ;;  %v3136_v27 = vld [vmem:[%s4769_s12 + $0x88] sm:$0xff] }
 0x7bd   :  { %v1040_v41 = vadd.f32 %v3079_v39, %v1039_v30  ;;  %v3923_v31 = vpack.c.bf16 %v3136_v27, %v3135_v26 }
 0x7be   :  { %v1206_v32 = vmax.f32 %v1203_v29, 0.0  ;;  %v1049_v42 = vmax.f32 %v1045_v40, 0.0  ;;  %v3140_v40 = vld [vmem:[%s4769_s12 + $0xa8] sm:$0xff] }
 0x7bf   :  { %v1048_v43 = vmax.f32 %v1040_v41, 0.0 }
 0x7c0   :  { %3567 = vmatmul.mubr.msk.f32.vlgmr.msra.gmra.mrb[18].mxu0 %vm361_vm4, %v1206_v32 }
 0x7c1   :  { %3900 = vmatpush3.bf16.msra.mxu0 %v3897_v58 }
 0x7c2   :  { %3902 = vmatprep.subr.bf16.mxu0 %v3901_v60 }
 0x7c5   :  { %3904 = vmatpush3.bf16.msra.mxu0 %v3901_v60 }
 0x7c6   :  { %3906 = vmatprep.subr.bf16.mxu0 %v3905_v63 }
 0x7c9   :  { %3908 = vmatpush3.bf16.msra.mxu0 %v3905_v63 }
 0x7ca   :  { %3910 = vmatprep.subr.bf16.mxu0 %v3909_v17 }
 0x7cd   :  { %3912 = vmatpush3.bf16.msra.mxu0 %v3909_v17 }
 0x893   :  { %v1293_v34 = vpop.f32.mrb[18].mxu0 }
 0x894   :  { %v1294_v35 = vadd.f32 %v3099_v33, %v1293_v34  ;;  %v3568_v36 = vpop.f32.mrb[19].mxu0 }
 0x895   :  { %v3138_v36 = vld [vmem:[%s4769_s12 + $0x98] sm:$0xff] }
 0x896   :  { %v4421_v38 = vmax.f32 %v1294_v35, 0.0  ;;  %v3137_v35 = vld [vmem:[%s4769_s12 + $0x90] sm:$0xff] }
 0x897   :  { %v3926_v39 = vpack.c.bf16 %v3138_v36, %v3137_v35  ;;  %v3175_v36 = vld [vmem:[%s4767_s10 + $0x70] sm:$0xff] }
 0x898   :  { %3569 = vmatprep.subr.msk.mxu1 %vm82_vm5, %v4421_v38 }
 0x899   :  { %3570 = vmatpush3.msk.msra.mxu1 %vm82_vm5, %v4421_v38 }
 0x89a   :  { %3572 = vmatmul.mubr.msk.f32.vlgmr.msra.gmra.mrb[8].mxu1 %vm75_vm0, %v4164_v1 }
 0x89b   :  { %3578 = vmatprep.mubr.msk.f32.mxu1 %vm163_vm1, %v4175_v3 }
 0x96d   :  { %v3573_v44 = vpop.f32.mrb[8].mxu1 }
 0x96e   :  { %v1378_v45 = vadd.f32 %v3573_v44, %v1049_v42  ;;  %v1368_v46 = vpop.f32.mrb[9].mxu1  ;;  %v3141_v42 = vld [vmem:[%s4769_s12 + $0xb0] sm:$0xff] }
 0x96f   :  { %v1377_v49 = vadd.f32 %v1368_v46, %v1048_v43  ;;  %v3142_v43 = vld [vmem:[%s4769_s12 + $0xb8] sm:$0xff] }
 0x970   :  { %v1457_v5 = vmul.f32 %v1455_v4, %v1378_v45  ;;  %v3932_v44 = vpack.c.bf16 %v3142_v43, %v3141_v42 }
 0x971   :  { %v3885_v50 = vpack.c.bf16 %v1378_v45, %v1377_v49  ;;  %v1456_v7 = vmul.f32 %v1455_v4, %v1377_v49  ;;  %v3133_v45 = vld [vmem:[%s4768_s11 + $0x2] ss:$0 sm:$0xff] }
 0x973   :  { %3886 = vmatprep.subr.bf16.mxu1 %v3885_v50 }
 0x974   :  { %3888 = vmatpush3.bf16.msra.mxu1 %v3885_v50 }
 0x975   :  { %3890 = vmatprep.subr.bf16.mxu1 %v3889_v51 }
 0x977   :  { %3579 = vmatmul.mubr.msk.f32.vlgmr.msra.gmra.mrb[10].mxu1 %vm163_vm1, %v4194_v14 }
 0x978   :  { %3892 = vmatpush3.bf16.msra.mxu1 %v3889_v51 }
 0x979   :  { %3894 = vmatprep.subr.bf16.mxu1 %v3893_v54 }
 0x97c   :  { %3896 = vmatpush3.bf16.msra.mxu1 %v3893_v54 }
 0x97d   :  { %3913 = vmatprep.subr.bf16.mxu1 %v4065_v18 }
 0xa4a   :  { %v3580_v6 = vpop.f32.mrb[10].mxu1 }
 0xa4b   :  { %v1459_v8 = vadd.f32 %v3580_v6, %v1457_v5  ;;  %v1445_v9 = vpop.f32.mrb[11].mxu1  ;;  %v3152_v5 = vld [vmem:[%s4763_s6 + $0x60] sm:$0xff]  ;;  %v3153_v6 = vld [vmem:[%s4763_s6 + $0x68] sm:$0xff] }
 0xa4c   :  { %v1458_v10 = vadd.f32 %v1456_v7, %v1445_v9  ;;  %v3938_v9 = vpack.c.bf16 %v3153_v6, %v3152_v5 }
 0xa4e   :  { %3589 = vmatprep.mubr.msk.f32.mxu1 %vm262_vm2, %v1458_v10  ;;  %v3154_v10 = vld [vmem:[%s4763_s6 + $0x70] sm:$0xff] }
 0xa4f   :  { %3590 = vmatmul.mubr.msk.f32.vlgmr.msra.gmra.mrb[12].mxu1 %vm262_vm2, %v1459_v8  ;;  %v3942_v12 = vpack.c.bf16 %v3155_v11, %v3154_v10 }
 0xa50   :  { %3915 = vmatpush3.bf16.msra.mxu1 %v3885_v50  ;;  %3615 = vmatprep.mubr.msk.f32.mxu1 %vm4066_vm3, %v4064_v2 }
 0xa51   :  { %3916 = vmatprep.subr.bf16.mxu1 %v4065_v18 }
 0xa53   :  { %3616 = vmatmul.mubr.msk.f32.vlgmr.msra.gmra.mrb[14].mxu1 %vm163_vm1, %v4236_v37 }
 0xa54   :  { %3626 = vmatprep.mubr.msk.f32.mxu1 %vm4066_vm3, %v4064_v2  ;;  %3918 = vmatpush3.bf16.msra.mxu1 %v3917_v13  ;;  %v3160_v13 = vld [vmem:[%s4765_s8 + $0xc0] sm:$0xff] }
 0xa55   :  { %3919 = vmatprep.subr.bf16.mxu1 %v4065_v18  ;;  %v3946_v17 = vpack.c.bf16 %v3161_v15, %v3160_v13  ;;  %v3169_v13 = vld [vmem:[%s4766_s9 + $0x3] ss:$0 sm:$0xff] }
 0xa58   :  { %3921 = vmatpush3.bf16.msra.mxu1 %v3920_v21  ;;  %v3164_v21 = vld [vmem:[%s4765_s8 + $0xe0] sm:$0xff] }
 0xa59   :  { %3922 = vmatprep.subr.bf16.mxu1 %v4065_v18 }
 0xb22   :  { %v3591_v23 = vpop.f32.mrb[12].mxu1 }
 0xb23   :  { %v1551_v24 = vadd.f32 %v3591_v23, %v3112_v22  ;;  %v1545_v25 = vpop.f32.mrb[13].mxu1 }
 0xb24   :  { %v1546_v28 = vadd.f32 %v3112_v22, %v1545_v25  ;;  %v3165_v22 = vld [vmem:[%s4765_s8 + $0xe8] sm:$0xff] }
 0xb25   :  { %v1555_v32 = vmax.f32 %v1551_v24, 0.0  ;;  %v3954_v23 = vpack.c.bf16 %v3165_v22, %v3164_v21  ;;  %v2061_v24 = vstv %s2060_s30 }
 0xb26   :  { %v1554_v29 = vmax.f32 %v1546_v28, 0.0  ;;  %v1722_v30 = vpop.f32.mrb[14].mxu1 }
 0xb27   :  { %v1723_v33 = vadd.f32 %v1722_v30, %v4421_v38  ;;  %v3617_v34 = vpop.f32.mrb[15].mxu1  ;;  %v3139_v38 = vld [vmem:[%s4769_s12 + $0xa0] sm:$0xff] }
 0xb28   :  { %3608 = vmatprep.mubr.msk.f32.mxu0 %vm361_vm4, %v1554_v29  ;;  %v3929_v41 = vpack.c.bf16 %v3140_v40, %v3139_v38  ;;  %v3166_v34 = vld [vmem:[%s4765_s8 + $0xf0] sm:$0xff]  ;;  %v3157_v40 = vld [vmem:[%s4764_s7 + $0x3] ss:$0 sm:$0xff] }
 0xb29   :  { %3609 = vmatmul.mubr.msk.f32.vlgmr.msra.gmra.mrb[20].mxu0 %vm361_vm4, %v1555_v32  ;;  %3627 = vmatmul.mubr.msk.f32.vlgmr.msra.gmra.mrb[16].mxu1 %vm262_vm2, %v1723_v33  ;;  %v3174_v32 = vld [vmem:[%s4767_s10 + $0x68] sm:$0xff] }
 0xb2a   :  { %3924 = vmatpush3.bf16.msra.mxu1 %v3923_v31  ;;  %3645 = vmatprep.mubr.msk.f32.mxu1 %vm4066_vm3, %v4064_v2  ;;  %v3173_v31 = vld [vmem:[%s4767_s10 + $0x60] sm:$0xff] }
 0xb2b   :  { %3925 = vmatprep.subr.bf16.mxu1 %v4065_v18  ;;  %3650 = vmatprep.mubr.msk.f32.mxu0 %vm75_vm0, %v4159_v0  ;;  %v3966_v33 = vpack.c.bf16 %v3174_v32, %v3173_v31  ;;  %v3208_v32 = vld [vmem:[%s4765_s8 + $0x118] sm:$0xff] }
 0xb2e   :  { %3927 = vmatpush3.bf16.msra.mxu1 %v3926_v39  ;;  %v3176_v39 = vld [vmem:[%s4767_s10 + $0x78] sm:$0xff] }
 0xb2f   :  { %3928 = vmatprep.subr.bf16.mxu1 %v4065_v18  ;;  %v3969_v38 = vpack.c.bf16 %v3176_v39, %v3175_v36  ;;  %v2667_v36 = vstv %s2666_s26 }
 0xb32   :  { %3930 = vmatpush3.bf16.msra.mxu1 %v3929_v41 }
 0xb33   :  { %3931 = vmatprep.subr.bf16.mxu1 %v4065_v18 }
 0xb36   :  { %3933 = vmatpush3.bf16.msra.mxu1 %v3932_v44  ;;  %v3180_v44 = vld [vmem:[%s4769_s12 + $0xc0] sm:$0xff] }
 0xb37   :  { %3947 = vmatprep.subr.bf16.mxu1 %v3946_v17 }
 0xbfc   :  { %v3610_v46 = vpop.f32.mrb[20].mxu0  ;;  %v1808_v47 = vpop.f32.mrb[16].mxu1 }
 0xbfd   :  { %v1809_v48 = vadd.f32 %v3133_v45, %v1808_v47  ;;  %v1645_v49 = vpop.f32.mrb[21].mxu0  ;;  %v3628_v50 = vpop.f32.mrb[17].mxu1  ;;  %v1651_v58 = vadd.f32 %v3610_v46, %v3124_v57  ;;  %v3181_v45 = vld [vmem:[%s4769_s12 + $0xc8] sm:$0xff] }
 0xbfe   :  { %v1646_v59 = vadd.f32 %v3124_v57, %v1645_v49  ;;  %v3972_v49 = vpack.c.bf16 %v3181_v45, %v3180_v44  ;;  %v3185_v57 = vld [vmem:[%s4769_s12 + $0xe8] sm:$0xff]  ;;  %v3211_v44 = vld [vmem:[%s4765_s8 + $0x130] sm:$0xff]  ;;  %v3212_v45 = vld [vmem:[%s4765_s8 + $0x138] sm:$0xff] }
 0xbff   :  { %v1812_v51 = vmax.f32 %v1809_v48, 0.0  ;;  %v1655_v60 = vmax.f32 %v1651_v58, 0.0 }
 0xc00   :  { %v1654_v61 = vmax.f32 %v1646_v59, 0.0  ;;  %v3186_v59 = vld [vmem:[%s4769_s12 + $0xf0] sm:$0xff] }
 0xc01   :  { %3646 = vmatmul.mubr.msk.f32.vlgmr.msra.gmra.mrb[18].mxu1 %vm361_vm4, %v1812_v51 }
 0xc02   :  { %3949 = vmatpush3.bf16.msra.mxu1 %v3946_v17 }
 0xc03   :  { %3951 = vmatprep.subr.bf16.mxu1 %v3950_v19 }
 0xc06   :  { %3953 = vmatpush3.bf16.msra.mxu1 %v3950_v19 }
 0xc07   :  { %3955 = vmatprep.subr.bf16.mxu1 %v3954_v23 }
 0xc0a   :  { %3957 = vmatpush3.bf16.msra.mxu1 %v3954_v23  ;;  %v3197_v23 = vld [vmem:[%s4763_s6 + $0x80] sm:$0xff] }
 0xcd4   :  { %v1899_v53 = vpop.f32.mrb[18].mxu1 }
 0xcd5   :  { %v1900_v54 = vadd.f32 %v3144_v52, %v1899_v53  ;;  %v3647_v55 = vpop.f32.mrb[19].mxu1  ;;  %v3182_v53 = vld [vmem:[%s4769_s12 + $0xd0] sm:$0xff] }
 0xcd7   :  { %v4541_v56 = vmax.f32 %v1900_v54, 0.0  ;;  %v3183_v54 = vld [vmem:[%s4769_s12 + $0xd8] sm:$0xff] }
 0xcd8   :  { %v3975_v55 = vpack.c.bf16 %v3183_v54, %v3182_v53  ;;  %v3214_v54 = vld [vmem:[%s4766_s9 + $0x4] ss:$0 sm:$0xff] }
 0xcd9   :  { %3648 = vmatprep.subr.msk.mxu0 %vm82_vm5, %v4541_v56 }
 0xcda   :  { %3649 = vmatpush3.msk.msra.mxu0 %vm82_vm5, %v4541_v56 }
 0xcdb   :  { %3651 = vmatmul.mubr.msk.f32.vlgmr.msra.gmra.mrb[22].mxu0 %vm75_vm0, %v4164_v1 }
 0xcdc   :  { %3657 = vmatprep.mubr.msk.f32.mxu0 %vm163_vm1, %v4175_v3 }
 0xdae   :  { %v3652_v62 = vpop.f32.mrb[22].mxu0 }
 0xdaf   :  { %v1984_v63 = vadd.f32 %v3652_v62, %v1655_v60  ;;  %v1974_v4 = vpop.f32.mrb[23].mxu0  ;;  %v3187_v60 = vld [vmem:[%s4769_s12 + $0xf8] sm:$0xff] }
 0xdb0   :  { %v1983_v7 = vadd.f32 %v1974_v4, %v1654_v61  ;;  %v3981_v61 = vpack.c.bf16 %v3187_v60, %v3186_v59  ;;  %v2940_v59 = vld [vmem:[%s4771_s14] sm:$0xff]  ;;  %v2941_v60 = vld [vmem:[%s4771_s14 + $0x8] sm:$0xff] }
 0xdb1   :  { %v2063_v25 = vmul.f32 %v2061_v24, %v1984_v63 }
 0xdb2   :  { %v3934_v8 = vpack.c.bf16 %v1984_v63, %v1983_v7  ;;  %v2062_v27 = vmul.f32 %v2061_v24, %v1983_v7 }
 0xdb4   :  { %3935 = vmatprep.subr.bf16.mxu0 %v3934_v8 }
 0xdb5   :  { %3937 = vmatpush3.bf16.msra.mxu0 %v3934_v8 }
 0xdb6   :  { %3939 = vmatprep.subr.bf16.mxu0 %v3938_v9 }
 0xdb8   :  { %3658 = vmatmul.mubr.msk.f32.vlgmr.msra.gmra.mrb[24].mxu0 %vm163_vm1, %v4194_v14 }
 0xdb9   :  { %3941 = vmatpush3.bf16.msra.mxu0 %v3938_v9 }
 0xdba   :  { %3943 = vmatprep.subr.bf16.mxu0 %v3942_v12 }
 0xdbd   :  { %3945 = vmatpush3.bf16.msra.mxu0 %v3942_v12 }
 0xdbe   :  { %3962 = vmatprep.subr.bf16.mxu0 %v4065_v18 }
 0xe8b   :  { %v3659_v26 = vpop.f32.mrb[24].mxu0 }
 0xe8c   :  { %v2065_v28 = vadd.f32 %v3659_v26, %v2063_v25  ;;  %v2051_v29 = vpop.f32.mrb[25].mxu0  ;;  %v3199_v26 = vld [vmem:[%s4763_s6 + $0x90] sm:$0xff] }
 0xe8d   :  { %v2064_v30 = vadd.f32 %v2062_v27, %v2051_v29  ;;  %v3200_v27 = vld [vmem:[%s4763_s6 + $0x98] sm:$0xff]  ;;  %v3205_v29 = vld [vmem:[%s4765_s8 + $0x100] sm:$0xff] }
 0xe8f   :  { %3668 = vmatprep.mubr.msk.f32.mxu0 %vm262_vm2, %v2064_v30  ;;  %v3207_v30 = vld [vmem:[%s4765_s8 + $0x110] sm:$0xff] }
 0xe90   :  { %3669 = vmatmul.mubr.msk.f32.vlgmr.msra.gmra.mrb[26].mxu0 %vm262_vm2, %v2065_v28  ;;  %v3991_v28 = vpack.c.bf16 %v3200_v27, %v3199_v26 }
 0xe91   :  { %3964 = vmatpush3.bf16.msra.mxu0 %v3934_v8  ;;  %3694 = vmatprep.mubr.msk.f32.mxu0 %vm4066_vm3, %v4064_v2  ;;  %v3189_v8 = vld [vmem:[%s4770_s13 + $0x3] ss:$0 sm:$0xff] }
 0xe92   :  { %3965 = vmatprep.subr.bf16.mxu0 %v4065_v18 }
 0xe94   :  { %3695 = vmatmul.mubr.msk.f32.vlgmr.msra.gmra.mrb[28].mxu0 %vm163_vm1, %v4236_v37  ;;  %v3167_v37 = vld [vmem:[%s4765_s8 + $0xf8] sm:$0xff] }
 0xe95   :  { %3705 = vmatprep.mubr.msk.f32.mxu0 %vm4066_vm3, %v4064_v2  ;;  %3967 = vmatpush3.bf16.msra.mxu0 %v3966_v33  ;;  %v3958_v35 = vpack.c.bf16 %v3167_v37, %v3166_v34  ;;  %v3999_v33 = vpack.c.bf16 %v3208_v32, %v3207_v30  ;;  %v3209_v34 = vld [vmem:[%s4765_s8 + $0x120] sm:$0xff]  ;;  %v3210_v37 = vld [vmem:[%s4765_s8 + $0x128] sm:$0xff] }
 0xe96   :  { %3968 = vmatprep.subr.bf16.mxu0 %v4065_v18 }
 0xe97   :  { %3959 = vmatprep.subr.bf16.mxu1 %v3958_v35 }
 0xe98   :  { %3961 = vmatpush3.bf16.msra.mxu1 %v3958_v35  ;;  %v4003_v35 = vpack.c.bf16 %v3210_v37, %v3209_v34 }
 0xe99   :  { %3970 = vmatpush3.bf16.msra.mxu0 %v3969_v38 }
 0xe9a   :  { %3971 = vmatprep.subr.bf16.mxu0 %v4065_v18 }
 0xf63   :  { %v3670_v41 = vpop.f32.mrb[26].mxu0 }
 0xf64   :  { %v2157_v42 = vadd.f32 %v3670_v41, %v3157_v40  ;;  %v2151_v43 = vpop.f32.mrb[27].mxu0 }
 0xf65   :  { %v2152_v46 = vadd.f32 %v3157_v40, %v2151_v43 }
 0xf66   :  { %v2161_v50 = vmax.f32 %v2157_v42, 0.0 }
 0xf67   :  { %v2160_v47 = vmax.f32 %v2152_v46, 0.0  ;;  %v2328_v48 = vpop.f32.mrb[28].mxu0  ;;  %v4007_v46 = vpack.c.bf16 %v3212_v45, %v3211_v44 }
 0xf68   :  { %v2329_v51 = vadd.f32 %v2328_v48, %v4541_v56  ;;  %v3696_v52 = vpop.f32.mrb[29].mxu0  ;;  %v3184_v56 = vld [vmem:[%s4769_s12 + $0xe0] sm:$0xff] }
 0xf69   :  { %3687 = vmatprep.mubr.msk.f32.mxu1 %vm361_vm4, %v2160_v47  ;;  %v3978_v58 = vpack.c.bf16 %v3185_v57, %v3184_v56  ;;  %v3202_v47 = vld [vmem:[%s4764_s7 + $0x4] ss:$0 sm:$0xff] }
 0xf6a   :  { %3688 = vmatmul.mubr.msk.f32.vlgmr.msra.gmra.mrb[20].mxu1 %vm361_vm4, %v2161_v50  ;;  %3706 = vmatmul.mubr.msk.f32.vlgmr.msra.gmra.mrb[30].mxu0 %vm262_vm2, %v2329_v51 }
 0xf6b   :  { %3973 = vmatpush3.bf16.msra.mxu0 %v3972_v49  ;;  %3724 = vmatprep.mubr.msk.f32.mxu0 %vm4066_vm3, %v4064_v2 }
 0xf6c   :  { %3974 = vmatprep.subr.bf16.mxu0 %v4065_v18  ;;  %3729 = vmatprep.mubr.msk.f32.mxu1 %vm75_vm0, %v4159_v0  ;;  %v3178_v0 = vld [vmem:[%s4768_s11 + $0x3] ss:$0 sm:$0xff] }
 0xf6f   :  { %3976 = vmatpush3.bf16.msra.mxu0 %v3975_v55 }
 0xf70   :  { %3977 = vmatprep.subr.bf16.mxu0 %v4065_v18 }
 0xf73   :  { %3979 = vmatpush3.bf16.msra.mxu0 %v3978_v58 }
 0xf74   :  { %3980 = vmatprep.subr.bf16.mxu0 %v4065_v18 }
 0xf77   :  { %3982 = vmatpush3.bf16.msra.mxu0 %v3981_v61 }
0x103d   :  { %v3689_v62 = vpop.f32.mrb[20].mxu1  ;;  %v2414_v63 = vpop.f32.mrb[30].mxu0 }
0x103e   :  { %v2415_v4 = vadd.f32 %v3178_v0, %v2414_v63  ;;  %v2251_v5 = vpop.f32.mrb[21].mxu1  ;;  %v3707_v6 = vpop.f32.mrb[31].mxu0  ;;  %v2257_v15 = vadd.f32 %v3689_v62, %v3169_v13  ;;  %v2866_v0 = vld [vmem:[%s4761_s4] sm:$0x3]  ;;  %v4015_v62 = vpack.c.bf16 %v2941_v60, %v2940_v59  ;;  %v2942_v63 = vld [vmem:[%s4771_s14 + $0x10] sm:$0xff] }
0x103f   :  { %v2252_v16 = vadd.f32 %v3169_v13, %v2251_v5 }
0x1040   :  { %v2418_v7 = vmax.f32 %v2415_v4, 0.0  ;;  %v2261_v17 = vmax.f32 %v2257_v15, 0.0  ;;  %v2943_v4 = vld [vmem:[%s4771_s14 + $0x18] sm:$0xff]  ;;  %s3032_s14 = sshll.u32 %s4067_s20, 4  ;;  %s3033_s14 = int_to_ptr.vmem [resolvable:$true] %s3032_s14 }
0x1041   :  { %v2260_v20 = vmax.f32 %v2252_v16, 0.0  ;;  %v4018_v5 = vpack.c.bf16 %v2943_v4, %v2942_v63  ;;  %p4042_p6 = scmp.lt.s32.totalorder %s3033_s14, %s3033_s14 }
0x1042   :  { %3725 = vmatmul.mubr.msk.f32.vlgmr.msra.gmra.mrb[32].mxu0 %vm361_vm4, %v2418_v7 }
0x1115   :  { %v2505_v9 = vpop.f32.mrb[32].mxu0 }
0x1116   :  { %v2506_v10 = vadd.f32 %v3189_v8, %v2505_v9  ;;  %v3726_v11 = vpop.f32.mrb[33].mxu0  ;;  %v3218_v8 = vld [vmem:[%s4772_s15] ss:$0 sm:$0xff] }
0x1118   :  { %v2509_v12 = vmax.f32 %v2506_v10, 0.0 }
0x111a   :  { %3727 = vmatprep.subr.msk.mxu1 %vm82_vm5, %v2509_v12 }
0x111b   :  { %3728 = vmatpush3.msk.msra.mxu1 %vm82_vm5, %v2509_v12 }
0x111c   :  { %3730 = vmatmul.mubr.msk.f32.vlgmr.msra.gmra.mrb[22].mxu1 %vm75_vm0, %v4164_v1  ;;  %v3198_v1 = vld [vmem:[%s4763_s6 + $0x88] sm:$0xff]  ;;  %s4037_s6 = scalar_lea.vmem %s3033_s14, 32 }
0x111d   :  { %3736 = vmatprep.mubr.msk.f32.mxu1 %vm163_vm1, %v4175_v3  ;;  %v3987_v25 = vpack.c.bf16 %v3198_v1, %v3197_v23  ;;  %p4038_p5 = scmp.ne.s32.totalorder %s3033_s14, %s4037_s6  ;;  %p4043_p7 = scmp.lt.s32.totalorder %s4037_s6, %s4037_s6 }
0x111f   :  { %p4044_p8 = por %p4043_p7, %p4042_p6 }
0x1121   :  { %p4045_p9 = pnand %p4044_p8, %p4038_p5 }
0x11ef   :  { %v3731_v19 = vpop.f32.mrb[22].mxu1 }
0x11f0   :  { %v2590_v21 = vadd.f32 %v3731_v19, %v2261_v17  ;;  %v2580_v22 = vpop.f32.mrb[23].mxu1 }
0x11f1   :  { %v2589_v3 = vadd.f32 %v2580_v22, %v2260_v20 }
0x11f2   :  { %v2669_v39 = vmul.f32 %v2667_v36, %v2590_v21 }
0x11f3   :  { %v3983_v24 = vpack.c.bf16 %v2590_v21, %v2589_v3  ;;  %v2668_v40 = vmul.f32 %v2667_v36, %v2589_v3 }
0x11f5   :  { %3984 = vmatprep.subr.bf16.mxu1 %v3983_v24 }
0x11f6   :  { %3986 = vmatpush3.bf16.msra.mxu1 %v3983_v24 }
0x11f7   :  { %3988 = vmatprep.subr.bf16.mxu1 %v3987_v25 }
0x11f9   :  { %3737 = vmatmul.mubr.msk.f32.vlgmr.msra.gmra.mrb[24].mxu1 %vm163_vm1, %v4194_v14  ;;  %v3206_v14 = vld [vmem:[%s4765_s8 + $0x108] sm:$0xff] }
0x11fa   :  { %3990 = vmatpush3.bf16.msra.mxu1 %v3987_v25  ;;  %v3995_v31 = vpack.c.bf16 %v3206_v14, %v3205_v29 }
0x11fb   :  { %3992 = vmatprep.subr.bf16.mxu1 %v3991_v28 }
0x11fc   :  { %3996 = vmatprep.subr.bf16.mxu0 %v3995_v31 }
0x11fd   :  { %3998 = vmatpush3.bf16.msra.mxu0 %v3995_v31 }
0x11fe   :  { %3994 = vmatpush3.bf16.msra.mxu1 %v3991_v28  ;;  %4000 = vmatprep.subr.bf16.mxu0 %v3999_v33 }
0x11ff   :  { %4011 = vmatprep.subr.bf16.mxu1 %v4065_v18 }
0x1201   :  { %4002 = vmatpush3.bf16.msra.mxu0 %v3999_v33 }
0x1202   :  { %4004 = vmatprep.subr.bf16.mxu0 %v4003_v35 }
0x1205   :  { %4006 = vmatpush3.bf16.msra.mxu0 %v4003_v35 }
0x1206   :  { %4008 = vmatprep.subr.bf16.mxu0 %v4007_v46 }
0x1209   :  { %4010 = vmatpush3.bf16.msra.mxu0 %v4007_v46 }
0x12cc   :  { %v3738_v38 = vpop.f32.mrb[24].mxu1 }
0x12cd   :  { %v2671_v41 = vadd.f32 %v3738_v38, %v2669_v39  ;;  %v2657_v42 = vpop.f32.mrb[25].mxu1 }
0x12ce   :  { %v2670_v43 = vadd.f32 %v2668_v40, %v2657_v42 }
0x12d0   :  { %3747 = vmatprep.mubr.msk.f32.mxu1 %vm262_vm2, %v2670_v43 }
0x12d1   :  { %3748 = vmatmul.mubr.msk.f32.vlgmr.msra.gmra.mrb[26].mxu1 %vm262_vm2, %v2671_v41 }
0x12d2   :  { %3773 = vmatprep.mubr.msk.f32.mxu1 %vm4066_vm3, %v4064_v2 }
0x13a4   :  { %v3749_v48 = vpop.f32.mrb[26].mxu1 }
0x13a5   :  { %v2763_v49 = vadd.f32 %v3749_v48, %v3202_v47  ;;  %v2757_v50 = vpop.f32.mrb[27].mxu1 }
0x13a6   :  { %v2758_v51 = vadd.f32 %v3202_v47, %v2757_v50 }
0x13a7   :  { %v2767_v53 = vmax.f32 %v2763_v49, 0.0 }
0x13a8   :  { %v2766_v52 = vmax.f32 %v2758_v51, 0.0 }
0x13aa   :  { %3766 = vmatprep.mubr.msk.f32.mxu0 %vm361_vm4, %v2766_v52 }
0x13ab   :  { %3767 = vmatmul.mubr.msk.f32.vlgmr.msra.gmra.mrb[34].mxu0 %vm361_vm4, %v2767_v53 }
0x147e   :  { %v3768_v55 = vpop.f32.mrb[34].mxu0 }
0x147f   :  { %v2863_v56 = vadd.f32 %v3768_v55, %v3214_v54  ;;  %v2857_v57 = vpop.f32.mrb[35].mxu0 }
0x1480   :  { %v2858_v58 = vadd.f32 %v3214_v54, %v2857_v57 }
0x1482   :  { %v4012_v61 = vpack.c.bf16 %v2863_v56, %v2858_v58 }
0x1484   :  { %4013 = vmatpush3.bf16.msra.mxu1 %v4012_v61 }
0x1485   :  { %4014 = vmatprep.subr.bf16.mxu1 %v4065_v18 }
0x1487   :  { %3774 = vmatmul.mubr.msk.f32.vlgmr.msra.gmra.mrb[28].mxu1 %vm163_vm1, %v2866_v0 }
0x1488   :  { %4016 = vmatpush3.bf16.msra.mxu1 %v4015_v62  ;;  %3784 = vmatprep.mubr.msk.f32.mxu1 %vm4066_vm3, %v4064_v2 }
0x1489   :  { %4017 = vmatprep.subr.bf16.mxu1 %v4065_v18 }
0x148c   :  { %4019 = vmatpush3.bf16.msra.mxu1 %v4018_v5 }
0x155a   :  { %v2936_v6 = vpop.f32.mrb[28].mxu1 }
0x155b   :  { %v3775_v7 = vpop.f32.mrb[29].mxu1  ;;  %3785 = vmatmul.mubr.msk.f32.vlgmr.msra.gmra.mrb[30].mxu1 %vm262_vm2, %v2936_v6 }
0x162e   :  { %v3020_v9 = vpop.f32.mrb[30].mxu1 }
0x162f   :  { %v3021_v10 = vadd.f32 %v3218_v8, %v3020_v9  ;;  %v3786_v11 = vpop.f32.mrb[31].mxu1 }
0x1631   :  { %3025 = vst.msk [vmem:[#allocation5] sm:$0x3] %vm3024_vm6, %v3021_v10 }
0x1632   :  { %4048 = shalt.err (!%p4045_p9)
}
0x1633   :  { %s4049_s23 = scalar_lea.hbm %s4773_s16, 32 }
0x1634   :  { %p4050_p10 = scmp.ne.s32.totalorder %s4773_s16, %s4049_s23  ;;  %p4053_p11 = scmp.lt.u32.totalorder %s4049_s23, %s4773_s16 }
0x1636   :  { %p4055_p12 = pnand %p4053_p11, %p4050_p10 }
0x1638   :  { %4058 = shalt.err (!%p4055_p12)
}
0x1639   :  { %3035 = dma.vmem_to_hbm [thread:$0]  %s3033_s14, 32, %s4773_s16, [#allocation3]  }
0x163a   :  { %4061 = dma.done.wait [#allocation3], 32  }
0x163b   :  { %4062 = vsyncadd [#allocation3], 4294967264 }
0x163c   :  { %3039 = vsyncpa [#allocation3], 1 }
0x163d   :  { %3040 = vsyncpa [#allocation4], 1 }

</bundles_post_ra>
